<compile_context>
chip_gen: v7x
topology: tpu7x:2x2x1
jax: 0.10.0
libtpu: 0.0.40
codegen_flags: <defaults>
</compile_context>

<pallas_src>
import functools

import jax
import jax.numpy as jnp
from jax.experimental import pallas as pl
from jax.experimental.pallas import tpu as pltpu


_LANE = 128
_VMEM_LIMIT_BYTES = 32 * 1024 * 1024    # explicit scoped-VMEM request
_FUSED_BLOCK_BUDGET = 8 * 1024 * 1024   # budget for 4x double-buffered fused blocks
_TILED_BLOCK_BUDGET = 20 * 1024 * 1024  # budget for 4x double-buffered spatial tiles


def _round_up(x, m):
    return (x + m - 1) // m * m


def _largest_divisor_leq(n, k):
    k = max(1, min(n, int(k)))
    while n % k:
        k -= 1
    return k


# --------------------------------------------------------------------------
# Path A: fused single-pass kernel (small per-batch slabs; x read once).
# --------------------------------------------------------------------------
def _cse_fused_kernel(x_ref, w1_ref, w2_ref, o_ref, *, inv_hw):
    # x_ref/o_ref: (NB, C, HWp)   w1_ref: (Cr, C)   w2_ref: (C, Cr)
    # Global average pool with fp32 accumulation only inside the reduce
    # (no full-block fp32 temp kept live across the FC).
    pooled = jnp.sum(x_ref[...].astype(jnp.float32), axis=-1) * inv_hw   # (NB, C)

    # Tiny FC on VPU/XLU (broadcast-multiply-reduce) -- the (C,1)/(Cr,1)
    # matvec would waste the MXU (<1/256 lane utilization).
    w1 = w1_ref[...].astype(jnp.float32)                                 # (Cr, C)
    w2 = w2_ref[...].astype(jnp.float32)                                 # (C, Cr)
    h = jnp.sum(pooled[:, None, :] * w1[None, :, :], axis=-1)            # (NB, Cr)
    h = jnp.maximum(h, 0.0)
    z = jnp.sum(h[:, None, :] * w2[None, :, :], axis=-1)                 # (NB, C)
    # exp runs on the EUP; the exact divide touches only NB*C elements.
    y = 1.0 / (1.0 + jnp.exp(-z))                                        # (NB, C)

    # Channel-wise rescale in the input dtype (no fp32 copy of the tile).
    # Note: for bf16 inputs on v5e the multiply is legalized to f32 internally.
    o_ref[...] = x_ref[...] * y.astype(o_ref.dtype)[:, :, None]


def _cse_fused(x_nchw, w1, w2):
    N, C, H, W = x_nchw.shape
    Cr = w1.shape[0]
    HW = H * W
    itemsize = x_nchw.dtype.itemsize

    # Lane-dense spatial axis (multiple of 128) -> unmasked stores.
    HWp = _round_up(HW, _LANE)
    x = x_nchw.reshape(N, C, HW)
    if HWp != HW:
        x = jnp.pad(x, ((0, 0), (0, 0), (0, HWp - HW)))  # zeros: sum unaffected

    # Several batch elements per grid step: amortizes ~0.35us/step overhead and
    # batches the tiny FC; keep >=2 grid steps (both v7x TensorCores) and keep
    # the 4x double-buffered in+out blocks under budget.
    slab = C * HWp * itemsize
    nb = max(1, _FUSED_BLOCK_BUDGET // (4 * slab))
    nb = min(nb, 64)
    if N >= 2:
        nb = min(nb, N // 2)
    nb = _largest_divisor_leq(N, nb)

    kernel = functools.partial(_cse_fused_kernel, inv_hw=1.0 / HW)
    out = pl.pallas_call(
        kernel,
        out_shape=jax.ShapeDtypeStruct((N, C, HWp), x_nchw.dtype),
        grid_spec=pltpu.PrefetchScalarGridSpec(
            num_scalar_prefetch=0,
            grid=(N // nb,),
            in_specs=[
                pl.BlockSpec((nb, C, HWp), lambda b: (b, 0, 0)),  # per-step x block
                pl.BlockSpec((Cr, C), lambda b: (0, 0)),          # fc1 weight (shared)
                pl.BlockSpec((C, Cr), lambda b: (0, 0)),          # fc2 weight (shared)
            ],
            out_specs=pl.BlockSpec((nb, C, HWp), lambda b: (b, 0, 0)),
        ),
        compiler_params=pltpu.CompilerParams(
            dimension_semantics=("parallel",),
            vmem_limit_bytes=_VMEM_LIMIT_BYTES,
        ),
    )(x, w1, w2)

    if HWp != HW:
        out = out[:, :, :HW]
    return out.reshape(N, C, H, W)


# --------------------------------------------------------------------------
# Path B: two-pass (pool kernel -> XLA-batched FC -> scale kernel),
# spatially tiled so VMEM is bounded independent of H*W.
# --------------------------------------------------------------------------
def _pool_kernel(x_ref, sum_ref):
    # x_ref: (1, C, HW_TILE)   sum_ref: (1, C, 1) fp32, resident across spatial axis
    @pl.when(pl.program_id(1) == 0)
    def _():
        sum_ref[...] = jnp.zeros_like(sum_ref)

    sum_ref[...] += jnp.sum(x_ref[...].astype(jnp.float32), axis=-1, keepdims=True)


def _scale_kernel(y_ref, x_ref, o_ref):
    # y_ref: (1, C, 1)   x_ref/o_ref: (1, C, HW_TILE) -- rescale in input dtype
    o_ref[...] = x_ref[...] * y_ref[...]


def _cse_two_pass(x_nchw, w1, w2, *, hw_tile=None):
    N, C, H, W = x_nchw.shape
    HW = H * W
    itemsize = x_nchw.dtype.itemsize

    # Spatial tile: multiple of 128 lanes, sized so 4x double-buffered in+out
    # blocks stay under budget (fits v5e's/v7x's scoped VMEM with headroom).
    hwp128 = _round_up(HW, _LANE)
    if hw_tile is None:
        budget_lanes = _TILED_BLOCK_BUDGET // (4 * C * itemsize)
        budget_lanes = max(_LANE, (budget_lanes // _LANE) * _LANE)
        hw_tile = min(hwp128, budget_lanes)
    hw_tile = max(_LANE, _round_up(int(hw_tile), _LANE))
    hw_tile = min(hw_tile, hwp128)
    n_tiles = pl.cdiv(hwp128, hw_tile)
    HWp = n_tiles * hw_tile

    x = x_nchw.reshape(N, C, HW)
    if HWp != HW:
        x = jnp.pad(x, ((0, 0), (0, 0), (0, HWp - HW)))  # zeros: sum unaffected

    # Pass 1: per-(batch, channel) spatial sums, fp32 accumulator resident
    # across the (last, "arbitrary") spatial grid axis.
    sums = pl.pallas_call(
        _pool_kernel,
        out_shape=jax.ShapeDtypeStruct((N, C, 1), jnp.float32),
        grid_spec=pltpu.PrefetchScalarGridSpec(
            num_scalar_prefetch=0,
            grid=(N, n_tiles),
            in_specs=[pl.BlockSpec((1, C, hw_tile), lambda b, t: (b, 0, t))],
            out_specs=pl.BlockSpec((1, C, 1), lambda b, t: (b, 0, 0)),
        ),
        compiler_params=pltpu.CompilerParams(
            dimension_semantics=("parallel", "arbitrary"),
            vmem_limit_bytes=_VMEM_LIMIT_BYTES,
        ),
    )(x)

    # Excitation: batched (N,C)@(C,Cr) FC + sigmoid in plain XLA (negligible
    # FLOPs; avoids a 1-column MXU matvec inside the kernel).
    pooled = sums[:, :, 0] * jnp.float32(1.0 / HW)                    # (N, C)
    h = jnp.maximum(pooled @ w1.astype(jnp.float32).T, 0.0)          # (N, Cr)
    y = jax.nn.sigmoid(h @ w2.astype(jnp.float32).T)                 # (N, C)
    y = y.astype(x_nchw.dtype).reshape(N, C, 1)

    # Pass 2: channel-wise rescale, fully parallel lane-dense tiles.
    # TODO(synk): pass input_output_aliases to alias x -> out when the caller donates x.
    out = pl.pallas_call(
        _scale_kernel,
        out_shape=jax.ShapeDtypeStruct((N, C, HWp), x_nchw.dtype),
        grid_spec=pltpu.PrefetchScalarGridSpec(
            num_scalar_prefetch=0,
            grid=(N, n_tiles),
            in_specs=[
                pl.BlockSpec((1, C, 1), lambda b, t: (b, 0, 0)),        # y (per-batch scales)
                pl.BlockSpec((1, C, hw_tile), lambda b, t: (b, 0, t)),  # x tile
            ],
            out_specs=pl.BlockSpec((1, C, hw_tile), lambda b, t: (b, 0, t)),
        ),
        compiler_params=pltpu.CompilerParams(
            dimension_semantics=("parallel", "parallel"),
            vmem_limit_bytes=_VMEM_LIMIT_BYTES,
        ),
    )(y, x)

    if HWp != HW:
        out = out[:, :, :HW]
    return out.reshape(N, C, H, W)


# --------------------------------------------------------------------------
# Public entry point.
# --------------------------------------------------------------------------
def cse_forward(x_nchw, w1, w2, *, force_two_pass=False, hw_tile=None):
    """CSE forward.  x_nchw: (N, C, H, W); w1: (C//r, C); w2: (C, C//r)."""
    N, C, H, W = x_nchw.shape
    HW = H * W
    itemsize = x_nchw.dtype.itemsize

    # Fused single-pass when the double-buffered per-step block is small
    # (x read from HBM once); otherwise spatially-tiled two-pass (costs a
    # second read of x but bounds VMEM and keeps the pipeline full).
    slab_bytes = C * _round_up(HW, _LANE) * itemsize
    use_two_pass = force_two_pass or (4 * slab_bytes > _FUSED_BLOCK_BUDGET)

    if use_two_pass:
        return _cse_two_pass(x_nchw, w1, w2, hw_tile=hw_tile)
    return _cse_fused(x_nchw, w1, w2)


def cse_reference(x_nchw, w1, w2):
    pooled = jnp.mean(x_nchw.astype(jnp.float32), axis=(2, 3))            # (N, C)
    h = jnp.maximum(pooled @ w1.astype(jnp.float32).T, 0.0)               # (N, C//r)
    y = jax.nn.sigmoid(h @ w2.astype(jnp.float32).T)                      # (N, C)
    return (x_nchw.astype(jnp.float32) * y[:, :, None, None]).astype(x_nchw.dtype)


if __name__ == "__main__":
    # Small shapes consistent with the module: width=64, reduction=16 -> hidden=4
    N, C, H, W = 2, 64, 16, 16
    reduction = 16
    Cr = C // reduction

    key = jax.random.PRNGKey(0)
    kx, k1, k2 = jax.random.split(key, 3)

    x = jax.random.normal(kx, (N, C, H, W), dtype=jnp.float32)

    # nn.Linear default init: U(-1/sqrt(fan_in), 1/sqrt(fan_in)), bias=False
    b1 = 1.0 / jnp.sqrt(jnp.float32(C))
    b2 = 1.0 / jnp.sqrt(jnp.float32(Cr))
    w1 = jax.random.uniform(k1, (Cr, C), minval=-b1, maxval=b1, dtype=jnp.float32)
    w2 = jax.random.uniform(k2, (C, Cr), minval=-b2, maxval=b2, dtype=jnp.float32)

    ref = cse_reference(x, w1, w2)

    # Path A: fused single-pass (auto-selected for this small shape).
    out_fused = jax.block_until_ready(cse_forward(x, w1, w2))
    assert out_fused.shape == (N, C, H, W)
    assert jnp.allclose(out_fused, ref, atol=1e-5, rtol=1e-5), "fused path mismatch"

    # Path B: spatially-tiled two-pass (pool + XLA FC + scale), forced so it
    # is exercised too (128-lane tiles -> grid (2, 2)).
    out_tiled = jax.block_until_ready(
        cse_forward(x, w1, w2, force_two_pass=True, hw_tile=128))
    assert out_tiled.shape == (N, C, H, W)
    assert jnp.allclose(out_tiled, ref, atol=1e-5, rtol=1e-5), "two-pass path mismatch"

    print("KERNEL_OK")
</pallas_src>

<mosaic_0001>
module attributes {stable_mosaic.version = 11 : i64} {
  func.func @_cse_fused_kernel(%arg0: i32, %arg1: memref<1x64x256xf32, #tpu.memory_space<vmem>>, %arg2: memref<4x64xf32, #tpu.memory_space<vmem>>, %arg3: memref<64x4xf32, #tpu.memory_space<vmem>>, %arg4: memref<1x64x256xf32, #tpu.memory_space<vmem>>) attributes {dimension_semantics = [#tpu.dimension_semantics<parallel>], iteration_bounds = array<i64: 2>, scalar_prefetch = 0 : i64, scratch_operands = 0 : i64, tpu.core_type = #tpu.core_type<tc>, window_params = [{transform_indices = @transform_0, window_bounds = array<i64: 1, 64, 256>}, {pipeline_mode = #tpu.pipeline_mode<synchronous>, transform_indices = @transform_1, window_bounds = array<i64: 4, 64>}, {pipeline_mode = #tpu.pipeline_mode<synchronous>, transform_indices = @transform_2, window_bounds = array<i64: 64, 4>}, {transform_indices = @transform_3, window_bounds = array<i64: 1, 64, 256>}]} {
    %c0 = arith.constant 0 : index
    %c0_0 = arith.constant 0 : index
    %c0_1 = arith.constant 0 : index
    %0 = vector.load %arg1[%c0, %c0_0, %c0_1] : memref<1x64x256xf32, #tpu.memory_space<vmem>>, vector<1x64x256xf32>
    %cst = arith.constant dense<0.000000e+00> : vector<1x64xf32>
    %1 = vector.multi_reduction <add>, %0, %cst [2] : vector<1x64x256xf32> to vector<1x64xf32>
    %cst_2 = arith.constant 3.906250e-03 : f32
    %2 = vector.broadcast %cst_2 : f32 to vector<1x64xf32>
    %3 = arith.mulf %1, %2 : vector<1x64xf32>
    %c0_3 = arith.constant 0 : index
    %c0_4 = arith.constant 0 : index
    %4 = vector.load %arg2[%c0_3, %c0_4] : memref<4x64xf32, #tpu.memory_space<vmem>>, vector<4x64xf32>
    %c0_5 = arith.constant 0 : index
    %c0_6 = arith.constant 0 : index
    %5 = vector.load %arg3[%c0_5, %c0_6] : memref<64x4xf32, #tpu.memory_space<vmem>>, vector<64x4xf32>
    %6 = vector.shape_cast %3 : vector<1x64xf32> to vector<1x1x64xf32>
    %7 = vector.shape_cast %4 : vector<4x64xf32> to vector<1x4x64xf32>
    %8 = vector.broadcast %6 : vector<1x1x64xf32> to vector<1x4x64xf32>
    %9 = arith.mulf %8, %7 : vector<1x4x64xf32>
    %cst_7 = arith.constant dense<0.000000e+00> : vector<1x4xf32>
    %10 = vector.multi_reduction <add>, %9, %cst_7 [2] : vector<1x4x64xf32> to vector<1x4xf32>
    %cst_8 = arith.constant 0.000000e+00 : f32
    %11 = vector.broadcast %cst_8 : f32 to vector<1x4xf32>
    %12 = arith.maximumf %10, %11 : vector<1x4xf32>
    %13 = vector.shape_cast %12 : vector<1x4xf32> to vector<1x1x4xf32>
    %14 = vector.shape_cast %5 : vector<64x4xf32> to vector<1x64x4xf32>
    %15 = vector.broadcast %13 : vector<1x1x4xf32> to vector<1x64x4xf32>
    %16 = arith.mulf %15, %14 : vector<1x64x4xf32>
    %cst_9 = arith.constant dense<0.000000e+00> : vector<1x64xf32>
    %17 = vector.multi_reduction <add>, %16, %cst_9 [2] : vector<1x64x4xf32> to vector<1x64xf32>
    %cst_10 = arith.constant 0.000000e+00 : f32
    %18 = vector.broadcast %cst_10 : f32 to vector<1x64xf32>
    %19 = arith.subf %18, %17 : vector<1x64xf32>
    %20 = math.exp %19 : vector<1x64xf32>
    %cst_11 = arith.constant 1.000000e+00 : f32
    %21 = vector.broadcast %cst_11 : f32 to vector<1x64xf32>
    %22 = arith.addf %21, %20 : vector<1x64xf32>
    %cst_12 = arith.constant 1.000000e+00 : f32
    %23 = vector.broadcast %cst_12 : f32 to vector<1x64xf32>
    %24 = arith.divf %23, %22 : vector<1x64xf32>
    %c0_13 = arith.constant 0 : index
    %c0_14 = arith.constant 0 : index
    %c0_15 = arith.constant 0 : index
    %25 = vector.load %arg1[%c0_13, %c0_14, %c0_15] : memref<1x64x256xf32, #tpu.memory_space<vmem>>, vector<1x64x256xf32>
    %26 = vector.shape_cast %24 : vector<1x64xf32> to vector<1x64x1xf32>
    %27 = vector.broadcast %26 : vector<1x64x1xf32> to vector<1x64x256xf32>
    %28 = arith.mulf %25, %27 : vector<1x64x256xf32>
    %c0_16 = arith.constant 0 : index
    %c0_17 = arith.constant 0 : index
    %c0_18 = arith.constant 0 : index
    %29 = vector.load %arg4[%c0_16, %c0_17, %c0_18] : memref<1x64x256xf32, #tpu.memory_space<vmem>>, vector<1x64x256xf32>
    tpu.vector_store %arg4[%c0_16, %c0_17, %c0_18], %28 {strides = array<i32>} : memref<1x64x256xf32, #tpu.memory_space<vmem>>, vector<1x64x256xf32>,
    return
  }
  func.func @transform_0(%arg0: i32) -> (i32, i32, i32) {
    %c0_i32 = arith.constant 0 : i32
    %c0_i32_0 = arith.constant 0 : i32
    %c0_i32_1 = arith.constant 0 : i32
    return %arg0, %c0_i32, %c0_i32_0 : i32, i32, i32
  }
  func.func @transform_1(%arg0: i32) -> (i32, i32) {
    %c0_i32 = arith.constant 0 : i32
    %c0_i32_0 = arith.constant 0 : i32
    %c0_i32_1 = arith.constant 0 : i32
    return %c0_i32, %c0_i32_0 : i32, i32
  }
  func.func @transform_2(%arg0: i32) -> (i32, i32) {
    %c0_i32 = arith.constant 0 : i32
    %c0_i32_0 = arith.constant 0 : i32
    %c0_i32_1 = arith.constant 0 : i32
    return %c0_i32, %c0_i32_0 : i32, i32
  }
  func.func @transform_3(%arg0: i32) -> (i32, i32, i32) {
    %c0_i32 = arith.constant 0 : i32
    %c0_i32_0 = arith.constant 0 : i32
    %c0_i32_1 = arith.constant 0 : i32
    return %arg0, %c0_i32, %c0_i32_0 : i32, i32, i32
  }
}

</mosaic_0001>

<bundles_post_ra>
// kernel: tpu_custom_call.1
= control target key start
LH: loop header
LB: loop body
LE: loop exit
PB: predicated region body
PF: predicated region fallthrough
CT: control target
= control target key end

     0   :  { %8 = vsyncpa [#allocation3], 0  ;;  %s3299_s0 = inlined_call_operand.hbm [shape: f32[2,64,256], index: 0, kind: input, shape index: {}]   ;;  %s3300_s1 = inlined_call_operand.vmem [shape: f32[4,64], index: 1, kind: input, shape index: {}]   ;;  %s3301_s2 = inlined_call_operand.vmem [shape: f32[64,4], index: 2, kind: input, shape index: {}]   ;;  %s3302_s3 = inlined_call_operand.hbm [shape: f32[2,64,256], index: 3, kind: output, shape index: {}]  }
   0x1   :  { %10 = vsyncpa [#allocation3 + $0x1], 0 }
   0x2   :  { %11 = vsyncpa [#allocation4], 0 }
   0x3   :  { %13 = vsyncpa [#allocation4 + $0x1], 0  ;;  %s2361_s12 = smov 0   ;;  %s2363_s13 = smov 0  }
   0x4   :  { %s2365_s14 = smov 0   ;;  %s2367_s15 = smov 0  }
   0x5 LB: > { %s2382_s16 = sadd.s32 4294967295, %s2332_s15   ;;  %s2119_s17 = sadd.s32 4294967294, %s2332_s15   ;;  %s2332_s15 = sphi %s2367_s15, %s3315_s15   ;;  %s2328_s14 = sphi %s2365_s14, %s3314_s14   ;;  %s2324_s13 = sphi %s2363_s13, %s3313_s13   ;;  %s2320_s12 = sphi %s2361_s12, %s3312_s12  }
   0x6   : > { %s2386_s18 = sadd.s32 1, %s2332_s15   ;;  %s26_s19 = sadd.s32 1, %s2328_s14 }
   0x7   : > { %s23_s20 = ssub.s32 %s2332_s15, %s2386_s18  ;;  %p33_p0 = scmp.ne.s32.totalorder %s2328_s14, %s2324_s13 }
   0x8   : > { %p24_p1 = scmp.eq.s32.totalorder %s23_s20, 0  ;;  %p34_p2 = scmp.eq.s32.totalorder %s2332_s15, 0 }
   0x9   : > { %p39_p3 = scmp.ne.s32.totalorder %s2324_s13, %s2320_s12  ;;  %p40_p4 = scmp.eq.s32.totalorder %s2382_s16, 0 }
   0xa   : > { %s2398_s21 = scalar_select %p24_p1, %s2328_s14, %s26_s19  }
   0xb   : > { %p2400_p5 = por %p34_p2, %p33_p0  ;;  %p2404_p6 = por %p40_p4, %p39_p3 }
   0xc   : > { %p105_p7 = scmp.eq.s32.totalorder %s2382_s16, 1  ;;  %p111_p8 = scmp.eq.s32.totalorder %s2119_s17, 1 }
   0xd   : > { %p2147_p10 = scmp.lt.s32.totalorder %s2332_s15, 2  ;;  %s137_s26 = sand.u32 1, %s2328_s14  }
   0xe   : > { %p2411_p11 = por %p105_p7, %p33_p0  ;;  %p2415_p12 = por %p111_p8, %p39_p3 }
   0xf   : > { %s2133_s27 = sshll.u32 %s2332_s15, 11  ;;  %s2122_s28 = sshll.u32 %s137_s26, 7 }
  0x10   : > { %s3306_s24 = scalar_select %p2411_p11, 1, 0 }
  0x11   : > { %s3307_s25 = scalar_select %p2415_p12, 1, 0 }
  0x12   : > { %s2424_s4 = scalar_lea.hbm %s3299_s0, %s2133_s27  ;;  %s141_s5 = scalar_lea.vmem [#allocation2], %s2122_s28 }
  0x13   : > { %s148_s6 = sshll.u32 %s141_s5, 4  ;;  %p2428_p13 = pnand %p2147_p10, %p2400_p5  ;;  %s2432_s6 = int_to_ptr.vmem [resolvable:$true] %s148_s6 }
  0x14   : > { %s2434_s8 = scalar_lea.sflag [#allocation3], %s137_s26  ;;  %s2236_s9 = scalar_lea.hbm %s2424_s4, 2048 }
  0x15   : > { %p2237_p0 = scmp.ne.s32.totalorder %s2424_s4, %s2236_s9  ;;  %p2238_p1 = pneg %p2428_p13 }
  0x16   : > { %s2241_s17 = scalar_lea.hbm %s3299_s0, 4096  ;;  %p2242_p4 = scmp.lt.u32.totalorder %s2424_s4, %s3299_s0 }
  0x17   : > { %p2239_p2 = pnand %p2238_p1, %p2237_p0  ;;  %p2243_p5 = scmp.lt.u32.totalorder %s2241_s17, %s2236_s9 }
  0x18   : > { %p2245_p8 = scmp.lt.u32.totalorder %s2236_s9, %s2424_s4 }
  0x19   : > { %p2240_p3 = pneg %p2239_p2  ;;  %p2244_p7 = por %p2243_p5, %p2242_p4 }
  0x1b   : > { %p2246_p10 = por %p2245_p8, %p2244_p7 }
  0x1d   : > { %p2247_p9 = pnand %p2246_p10, %p2240_p3 }
  0x1f   : > { %2250 = shalt.err (!%p2247_p9)
}
  0x20   : > { %s2251_s22 = scalar_lea.vmem %s2432_s6, 2048  ;;  %s2334_s26 = smov [#allocation2]  }
  0x21   : > { %p2252_p0 = scmp.ne.s32.totalorder %s2432_s6, %s2251_s22  ;;  %s2256_s27 = sshll.u32 %s2334_s26, 4  ;;  %s2257_s27 = int_to_ptr.vmem [resolvable:$false] %s2256_s27 }
  0x22   : > { %s2258_s28 = scalar_lea.vmem %s2257_s27, 4096  ;;  %p2259_p11 = scmp.lt.s32.totalorder %s2432_s6, %s2257_s27 }
  0x23   : > { %p2254_p2 = pnand %p2252_p0, %p2238_p1  ;;  %p2260_p4 = scmp.lt.s32.totalorder %s2258_s28, %s2251_s22 }
  0x25   : > { %p2255_p12 = pneg %p2254_p2  ;;  %p2261_p5 = por %p2260_p4, %p2259_p11 }
  0x27   : > { %p2262_p7 = pnand %p2261_p5, %p2255_p12 }
  0x29   : > { %2265 = shalt.err (!%p2262_p7)
}
  0x2a   : > { %s2335_s29 = smov 256   ;;  %s2336_s30 = smov 16  }
  0x2b   : > { %2142 = dma.hbm_to_vmem [thread:$0]  (!%p2428_p13), %s2424_s4, 2048, %s2432_s6, %s2434_s8, %s2335_s29, %s2335_s29, %s2336_s30  }
  0x2c   : > { %p2125_p9 = scmp.ge.s32.totalorder %s2332_s15, 1  ;;  %p156_p1 = scmp.lt.s32.totalorder %s2332_s15, 3 }
  0x2e   : > { %p157_p3 = pnand %p2125_p9, %p156_p1 }
  0x2f   : > { %s2465_s5 = sand.u32 (!%p157_p3), 1, %s2324_s13  }
  0x30   : > { %160 = sbr.rel (%p157_p3) target bundleno = 1006 (0x3ee), region = 32  ;;  %s2126_s9 = sshll.u32 (!%p157_p3), %s2465_s5, 7 }
  0x31   : > { %s163_s10 = scalar_lea.sflag (!%p157_p3), [#allocation3], %s2465_s5  ;;  %s2471_s11 = scalar_lea.vmem (!%p157_p3), [#allocation2], %s2126_s9 }
  0x37   : > { %2311 = dma.done.wait (%p2404_p6), %s163_s10, 2048  }
  0x38   : > { %2313 = vsyncadd (%p2404_p6), %s163_s10, 4294965248  ;;  %v193_v0 = vld [vmem:[%s2471_s11 + $0x20] sm:$0xff]  ;;  %v194_v1 = vld [vmem:[%s2471_s11 + $0x28] sm:$0xff]  ;;  %v247_v24 = vlaneseq  ;;  %v2337_v29 = vmov 0   ;;  %vm590_vm0 = vcmask 130112   ;;  %vm597_vm1 = vcmask 195712  }
  0x39   : > { %v189_v2 = vld [vmem:[%s2471_s11] sm:$0xff]  ;;  %v211_v3 = vadd.f32 %v194_v1, %v193_v0  ;;  %v190_v4 = vld [vmem:[%s2471_s11 + $0x8] sm:$0xff]  ;;  %v195_v5 = vld [vmem:[%s2471_s11 + $0x30] sm:$0xff]  ;;  %2187 = vset.pattern.permute.xlu1 %v2337_v29  ;;  %2186 = vset.pattern.permute.xlu0 %v2337_v29  ;;  %vm604_vm2 = vcmask 261312   ;;  %vm611_vm3 = vcmask 326912   ;;  %vm618_vm4 = vcmask 392512  }
  0x3a   : > { %v196_v6 = vld [vmem:[%s2471_s11 + $0x38] sm:$0xff]  ;;  %v205_v7 = vadd.f32 %v190_v4, %v189_v2  ;;  %v191_v8 = vld [vmem:[%s2471_s11 + $0x10] sm:$0xff]  ;;  %v197_v14 = vld [vmem:[%s2471_s11 + $0x40] sm:$0xff]  ;;  %v2494_v25 = vshrl.u32 %v247_v24, 7  ;;  %vm625_vm5 = vcmask 458112   ;;  %vm632_vm6 = vcmask 523712  }
  0x3b   : > { %v192_v9 = vld [vmem:[%s2471_s11 + $0x18] sm:$0xff]  ;;  %212 = vadd.xlane.f32.xlu1 %v211_v3  ;;  %v214_v10 = vadd.f32 %v196_v6, %v195_v5  ;;  %v199_v12 = vld [vmem:[%s2471_s11 + $0x50] sm:$0xff]  ;;  %v198_v15 = vld [vmem:[%s2471_s11 + $0x48] sm:$0xff]  ;;  %vm751_vm7 = vcmask 1041409   ;;  %vm753_vm8 = vcmask 1042434   ;;  %vm755_vm9 = vcmask 1043459  }
  0x3c   : > { %206 = vadd.xlane.f32.xlu0 %v205_v7  ;;  %v208_v11 = vadd.f32 %v192_v9, %v191_v8  ;;  %v200_v13 = vld [vmem:[%s2471_s11 + $0x58] sm:$0xff]  ;;  %v217_v17 = vadd.f32 %v198_v15, %v197_v14  ;;  %v203_v18 = vld [vmem:[%s2471_s11 + $0x70] sm:$0xff]  ;;  %v201_v20 = vld [vmem:[%s2471_s11 + $0x60] sm:$0xff]  ;;  %v2497_v26 = vsub.s32 0, %v2494_v25  ;;  %v2504_v30 = vsub.s32 1, %v2494_v25  ;;  %s3216_s7 = scalar_lea.vmem [#allocation5], %s2126_s9 }
  0x3d   : > { %v220_v16 = vadd.f32 %v200_v13, %v199_v12  ;;  %v204_v19 = vld [vmem:[%s2471_s11 + $0x78] sm:$0xff]  ;;  %v202_v21 = vld [vmem:[%s2471_s11 + $0x68] sm:$0xff]  ;;  %v237_v27 = vld [vmem:[%s3300_s1] sm:$0xf]  ;;  %v2508_v32 = vsub.s32 2, %v2494_v25  ;;  %v2512_v34 = vsub.s32 3, %v2494_v25 }
  0x3e   : > { %v226_v22 = vadd.f32 %v204_v19, %v203_v18  ;;  %v223_v23 = vadd.f32 %v202_v21, %v201_v20  ;;  %v250_v28 = vrot.slane %v237_v27, %v2497_v26  ;;  %v285_v31 = vrot.slane %v237_v27, %v2504_v30  ;;  %s2134_s9 = sshll.u32 %s2382_s16, 11  ;;  %s2046_s8 = sshll.u32 %s3216_s7, 4  ;;  %s3249_s8 = int_to_ptr.vmem [resolvable:$true] %s2046_s8 }
  0x3f   : > { %215 = vadd.xlane.f32.xlu1 %v214_v10  ;;  %v320_v33 = vrot.slane %v237_v27, %v2508_v32  ;;  %v355_v35 = vrot.slane %v237_v27, %v2512_v34  ;;  %vm758_vm10 = vcmask 519168   ;;  %vm1862_vm11 = vcmask 1044484   ;;  %s3247_s19 = scalar_lea.hbm %s3302_s3, %s2134_s9  ;;  %s2033_s20 = scalar_lea.sflag [#allocation4], %s2465_s5 }
  0x40   : > { %209 = vadd.xlane.f32.xlu0 %v208_v11  ;;  %vm1864_vm12 = vcmask 1045509   ;;  %vm1866_vm13 = vcmask 1046534   ;;  %vm1868_vm14 = vcmask 1047559   ;;  %vm1927_vm15 = vcmask 31744   ;;  %s2266_s22 = scalar_lea.vmem %s3249_s8, 2048  ;;  %p3309_p11 = scmp.ne.s32.totalorder %s3306_s24, 0 }
  0x41   : > { %p2267_p6 = scmp.ne.s32.totalorder %s3249_s8, %s2266_s22  ;;  %s2338_s26 = smov [#allocation5]  }
  0x42   : > { %s2270_s27 = sshll.u32 %s2338_s26, 4  ;;  %s2271_s27 = int_to_ptr.vmem [resolvable:$false] %s2270_s27 }
  0x43   : > { %221 = vadd.xlane.f32.xlu1 %v220_v16  ;;  %p2268_p12 = pnand %p2267_p6, %p3309_p11  ;;  %s2272_s28 = scalar_lea.vmem %s2271_s27, 4096 }
  0x44   : > { %218 = vadd.xlane.f32.xlu0 %v217_v17  ;;  %p2273_p8 = scmp.lt.s32.totalorder %s3249_s8, %s2271_s27  ;;  %p2274_p10 = scmp.lt.s32.totalorder %s2272_s28, %s2266_s22 }
  0x45   : > { %p2269_p13 = pneg %p2268_p12 }
  0x46   : > { %p2275_p0 = por %p2274_p10, %p2273_p8 }
  0x47   : > { %227 = vadd.xlane.f32.xlu1 %v226_v22 }
  0x48   : > { %224 = vadd.xlane.f32.xlu0 %v223_v23  ;;  %p2276_p2 = pnand %p2275_p0, %p2269_p13 }
  0x58   : > { %256 = vbcast.lane.b32.xlu1 %v250_v28, 264 }
  0x5c   : > { %260 = vbcast.lane.b32.xlu1 %v250_v28, 272 }
  0x5e   : > { %252 = vbcast.lane.b32.xlu0 %v250_v28, 256 }
  0x60   : > { %264 = vbcast.lane.b32.xlu1 %v250_v28, 280 }
  0x62   : > { %268 = vbcast.lane.b32.xlu0 %v250_v28, 288 }
  0x64   : > { %272 = vbcast.lane.b32.xlu1 %v250_v28, 296 }
  0x66   : > { %276 = vbcast.lane.b32.xlu0 %v250_v28, 304 }
  0x68   : > { %280 = vbcast.lane.b32.xlu1 %v250_v28, 312 }
  0x6a   : > { %287 = vbcast.lane.b32.xlu0 %v285_v31, 256 }
  0x6c   : > { %291 = vbcast.lane.b32.xlu1 %v285_v31, 264 }
  0x6e   : > { %295 = vbcast.lane.b32.xlu0 %v285_v31, 272 }
  0x70   : > { %299 = vbcast.lane.b32.xlu1 %v285_v31, 280 }
  0x72   : > { %303 = vbcast.lane.b32.xlu0 %v285_v31, 288 }
  0x74   : > { %307 = vbcast.lane.b32.xlu1 %v285_v31, 296 }
  0x76   : > { %311 = vbcast.lane.b32.xlu0 %v285_v31, 304 }
  0x78   : > { %315 = vbcast.lane.b32.xlu1 %v285_v31, 312 }
  0x7a   : > { %322 = vbcast.lane.b32.xlu0 %v320_v33, 256 }
  0x7c   : > { %326 = vbcast.lane.b32.xlu1 %v320_v33, 264 }
  0x7e   : > { %330 = vbcast.lane.b32.xlu0 %v320_v33, 272 }
  0x80   : > { %334 = vbcast.lane.b32.xlu1 %v320_v33, 280 }
  0x82   : > { %338 = vbcast.lane.b32.xlu0 %v320_v33, 288 }
  0x84   : > { %342 = vbcast.lane.b32.xlu1 %v320_v33, 296 }
  0x86   : > { %346 = vbcast.lane.b32.xlu0 %v320_v33, 304 }
  0x88   : > { %350 = vbcast.lane.b32.xlu1 %v320_v33, 312 }
  0x8a   : > { %357 = vbcast.lane.b32.xlu0 %v355_v35, 256 }
  0x8c   : > { %361 = vbcast.lane.b32.xlu1 %v355_v35, 264 }
  0x8e   : > { %365 = vbcast.lane.b32.xlu0 %v355_v35, 272 }
  0x90   : > { %369 = vbcast.lane.b32.xlu1 %v355_v35, 280 }
  0x92   : > { %373 = vbcast.lane.b32.xlu0 %v355_v35, 288 }
  0x94   : > { %377 = vbcast.lane.b32.xlu1 %v355_v35, 296 }
  0x96   : > { %381 = vbcast.lane.b32.xlu0 %v355_v35, 304 }
  0x98   : > { %385 = vbcast.lane.b32.xlu1 %v355_v35, 312 }
  0xc8   : > { %v213_v36 = vpop.xlane.xlu1 %212 }
  0xc9   : > { %v207_v37 = vpop.xlane.xlu0 %206  ;;  %v2521_v50 = vmul.f32 0.00390625, %v213_v36 }
  0xca   : > { %v2517_v45 = vmul.f32 0.00390625, %v207_v37 }
  0xcc   : > { %v216_v38 = vpop.xlane.xlu1 %215 }
  0xcd   : > { %v210_v39 = vpop.xlane.xlu0 %209  ;;  %v2524_v54 = vmul.f32 0.00390625, %v216_v38 }
  0xce   : > { %v2515_v44 = vmul.f32 0.00390625, %v210_v39 }
  0xd0   : > { %v222_v40 = vpop.xlane.xlu1 %221 }
  0xd1   : > { %v219_v41 = vpop.xlane.xlu0 %218  ;;  %v2530_v60 = vmul.f32 0.00390625, %v222_v40 }
  0xd2   : > { %v2526_v55 = vmul.f32 0.00390625, %v219_v41 }
  0xd4   : > { %v228_v42 = vpop.xlane.xlu1 %227 }
  0xd5   : > { %v225_v43 = vpop.xlane.xlu0 %224  ;;  %v2536_v2 = vmul.f32 0.00390625, %v228_v42 }
  0xd6   : > { %v2532_v61 = vmul.f32 0.00390625, %v225_v43 }
  0xd8   : > { %v257_v46 = vpop.permute.xlu1 %256 }
  0xd9   : > { %v420_v47 = vmul.f32 %v257_v46, %v2515_v44  ;;  %v253_v48 = vpop.permute.xlu0 %252 }
  0xda   : > { %v419_v49 = vmul.f32 %v253_v48, %v2517_v45 }
  0xdb   : > { %487 = vperm.xlu1 %2187, %v420_v47  }
  0xdc   : > { %484 = vperm.xlu0 %2186, %v419_v49   ;;  %v261_v51 = vpop.permute.xlu1 %260 }
  0xdd   : > { %v421_v52 = vmul.f32 %v261_v51, %v2521_v50  ;;  %v269_v53 = vpop.permute.xlu0 %268 }
  0xde   : > { %v423_v57 = vmul.f32 %v269_v53, %v2526_v55 }
  0xdf   : > { %490 = vperm.xlu1 %2187, %v421_v52  }
  0xe0   : > { %v265_v56 = vpop.permute.xlu1 %264 }
  0xe1   : > { %v422_v58 = vmul.f32 %v265_v56, %v2524_v54  ;;  %v277_v59 = vpop.permute.xlu0 %276 }
  0xe2   : > { %v425_v63 = vmul.f32 %v277_v59, %v2532_v61 }
  0xe3   : > { %493 = vperm.xlu0 %2186, %v422_v58   ;;  %496 = vperm.xlu1 %2187, %v423_v57   ;;  %v2563_v58 = vld [vmem:[%s3301_s2 + $0x8] sm:$0xff] }
  0xe4   : > { %v273_v62 = vpop.permute.xlu1 %272 }
  0xe5   : > { %v424_v0 = vmul.f32 %v273_v62, %v2530_v60  ;;  %v288_v1 = vpop.permute.xlu0 %287  ;;  %v238_v62 = vld [vmem:[%s3301_s2] sm:$0xff] }
  0xe6   : > { %v427_v4 = vmul.f32 %v288_v1, %v2517_v45  ;;  %v781_v1 = vrot.slane %v238_v62, %v2504_v30 }
  0xe7   : > { %499 = vperm.xlu0 %2186, %v424_v0   ;;  %502 = vperm.xlu1 %2187, %v425_v63   ;;  %v2582_v0 = vld [vmem:[%s3301_s2 + $0x10] sm:$0xff] }
  0xe8   : > { %v281_v3 = vpop.permute.xlu1 %280 }
  0xe9   : > { %v426_v5 = vmul.f32 %v281_v3, %v2536_v2  ;;  %v296_v6 = vpop.permute.xlu0 %295  ;;  %v893_v3 = vrot.slane %v2582_v0, %v2504_v30 }
  0xea   : > { %v429_v8 = vmul.f32 %v296_v6, %v2521_v50  ;;  %v795_v6 = vrot.slane %v238_v62, %v2512_v34 }
  0xeb   : > { %505 = vperm.xlu0 %2186, %v426_v5   ;;  %508 = vperm.xlu1 %2187, %v427_v4   ;;  %v907_v4 = vrot.slane %v2582_v0, %v2512_v34  ;;  %v2591_v5 = vsub.s32 5, %v2494_v25 }
  0xec   : > { %v292_v7 = vpop.permute.xlu1 %291 }
  0xed   : > { %v428_v9 = vmul.f32 %v292_v7, %v2515_v44  ;;  %v304_v10 = vpop.permute.xlu0 %303  ;;  %v921_v7 = vrot.slane %v2582_v0, %v2591_v5 }
  0xee   : > { %v431_v12 = vmul.f32 %v304_v10, %v2526_v55 }
  0xef   : > { %511 = vperm.xlu0 %2186, %v428_v9   ;;  %514 = vperm.xlu1 %2187, %v429_v8   ;;  %v2597_v8 = vsub.s32 4, %v2494_v25 }
  0xf0   : > { %v300_v11 = vpop.permute.xlu1 %299 }
  0xf1   : > { %v430_v13 = vmul.f32 %v300_v11, %v2524_v54  ;;  %v312_v14 = vpop.permute.xlu0 %311  ;;  %v802_v9 = vrot.slane %v238_v62, %v2597_v8  ;;  %v2605_v11 = vld [vmem:[%s3301_s2 + $0x18] sm:$0xff] }
  0xf2   : > { %v433_v16 = vmul.f32 %v312_v14, %v2532_v61  ;;  %v2611_v14 = vsub.s32 6, %v2494_v25 }
  0xf3   : > { %517 = vperm.xlu0 %2186, %v430_v13   ;;  %520 = vperm.xlu1 %2187, %v431_v12   ;;  %v809_v12 = vrot.slane %v238_v62, %v2591_v5  ;;  %v949_v13 = vrot.slane %v2605_v11, %v2504_v30 }
  0xf4   : > { %v308_v15 = vpop.permute.xlu1 %307 }
  0xf5   : > { %v432_v17 = vmul.f32 %v308_v15, %v2530_v60  ;;  %v323_v18 = vpop.permute.xlu0 %322  ;;  %v816_v15 = vrot.slane %v238_v62, %v2611_v14 }
  0xf6   : > { %v435_v20 = vmul.f32 %v323_v18, %v2517_v45  ;;  %v977_v18 = vrot.slane %v2605_v11, %v2591_v5 }
  0xf7   : > { %523 = vperm.xlu0 %2186, %v432_v17   ;;  %526 = vperm.xlu1 %2187, %v433_v16   ;;  %v963_v16 = vrot.slane %v2605_v11, %v2512_v34 }
  0xf8   : > { %v316_v19 = vpop.permute.xlu1 %315 }
  0xf9   : > { %v434_v21 = vmul.f32 %v316_v19, %v2536_v2  ;;  %v331_v22 = vpop.permute.xlu0 %330  ;;  %v830_v19 = vrot.slane %v2563_v58, %v2497_v26 }
  0xfa   : > { %v437_v27 = vmul.f32 %v331_v22, %v2521_v50  ;;  %v844_v22 = vrot.slane %v2563_v58, %v2508_v32 }
  0xfb   : > { %529 = vperm.xlu0 %2186, %v434_v21   ;;  %532 = vperm.xlu1 %2187, %v435_v20   ;;  %v2626_v21 = vld [vmem:[%s3301_s2 + $0x20] sm:$0xff] }
  0xfc   : > { %v327_v23 = vpop.permute.xlu1 %326 }
  0xfd   : > { %v436_v28 = vmul.f32 %v327_v23, %v2515_v44  ;;  %v339_v29 = vpop.permute.xlu0 %338  ;;  %v1005_v23 = vrot.slane %v2626_v21, %v2504_v30 }
  0xfe   : > { %v439_v33 = vmul.f32 %v339_v29, %v2526_v55  ;;  %v858_v29 = vrot.slane %v2563_v58, %v2597_v8 }
  0xff   : > { %535 = vperm.xlu0 %2186, %v436_v28   ;;  %538 = vperm.xlu1 %2187, %v437_v27   ;;  %v851_v27 = vrot.slane %v2563_v58, %v2512_v34  ;;  %v1019_v28 = vrot.slane %v2626_v21, %v2512_v34 }
 0x100   : > { %v335_v31 = vpop.permute.xlu1 %334 }
 0x101   : > { %v438_v35 = vmul.f32 %v335_v31, %v2524_v54  ;;  %v347_v36 = vpop.permute.xlu0 %346  ;;  %v1033_v31 = vrot.slane %v2626_v21, %v2591_v5 }
 0x102   : > { %v441_v38 = vmul.f32 %v347_v36, %v2532_v61  ;;  %v2647_v36 = vld [vmem:[%s3301_s2 + $0x28] sm:$0xff] }
 0x103   : > { %541 = vperm.xlu0 %2186, %v438_v35   ;;  %544 = vperm.xlu1 %2187, %v439_v33   ;;  %v865_v33 = vrot.slane %v2563_v58, %v2591_v5 }
 0x104   : > { %v343_v37 = vpop.permute.xlu1 %342 }
 0x105   : > { %v440_v39 = vmul.f32 %v343_v37, %v2530_v60  ;;  %v358_v40 = vpop.permute.xlu0 %357  ;;  %v872_v37 = vrot.slane %v2563_v58, %v2611_v14 }
 0x106   : > { %v443_v42 = vmul.f32 %v358_v40, %v2517_v45  ;;  %v1075_v40 = vrot.slane %v2647_v36, %v2512_v34 }
 0x107   : > { %547 = vperm.xlu0 %2186, %v440_v39   ;;  %550 = vperm.xlu1 %2187, %v441_v38   ;;  %v1061_v38 = vrot.slane %v2647_v36, %v2504_v30  ;;  %v886_v39 = vrot.slane %v2582_v0, %v2497_v26 }
 0x108   : > { %v351_v41 = vpop.permute.xlu1 %350 }
 0x109   : > { %v442_v43 = vmul.f32 %v351_v41, %v2536_v2  ;;  %v366_v46 = vpop.permute.xlu0 %365  ;;  %v900_v41 = vrot.slane %v2582_v0, %v2508_v32 }
 0x10a   : > { %v445_v48 = vmul.f32 %v366_v46, %v2521_v50  ;;  %v914_v46 = vrot.slane %v2582_v0, %v2597_v8 }
 0x10b   : > { %553 = vperm.xlu0 %2186, %v442_v43   ;;  %556 = vperm.xlu1 %2187, %v443_v42   ;;  %v1089_v42 = vrot.slane %v2647_v36, %v2591_v5 }
 0x10c   : > { %v362_v47 = vpop.permute.xlu1 %361 }
 0x10d   : > { %v444_v49 = vmul.f32 %v362_v47, %v2515_v44  ;;  %v374_v51 = vpop.permute.xlu0 %373 }
 0x10e   : > { %v447_v53 = vmul.f32 %v374_v51, %v2526_v55  ;;  %v837_v55 = vrot.slane %v2563_v58, %v2504_v30 }
 0x10f   : > { %559 = vperm.xlu0 %2186, %v444_v49   ;;  %562 = vperm.xlu1 %2187, %v445_v48   ;;  %v2670_v48 = vld [vmem:[%s3301_s2 + $0x30] sm:$0xff] }
 0x110   : > { %v370_v52 = vpop.permute.xlu1 %369 }
 0x111   : > { %v446_v56 = vmul.f32 %v370_v52, %v2524_v54  ;;  %v382_v57 = vpop.permute.xlu0 %381  ;;  %v2570_v54 = vsub.s32 7, %v2494_v25  ;;  %v928_v52 = vrot.slane %v2582_v0, %v2611_v14 }
 0x112   : > { %v449_v50 = vmul.f32 %v382_v57, %v2532_v61  ;;  %v774_v61 = vrot.slane %v238_v62, %v2497_v26 }
 0x113   : > { %565 = vperm.xlu0 %2186, %v446_v56   ;;  %568 = vperm.xlu1 %2187, %v447_v53   ;;  %v935_v10 = vrot.slane %v2582_v0, %v2570_v54  ;;  %v823_v17 = vrot.slane %v238_v62, %v2570_v54  ;;  %v991_v20 = vrot.slane %v2605_v11, %v2570_v54 }
 0x114   : > { %v378_v45 = vpop.permute.xlu1 %377  ;;  %v1047_v35 = vrot.slane %v2626_v21, %v2570_v54  ;;  %v1103_v47 = vrot.slane %v2647_v36, %v2570_v54  ;;  %v1117_v53 = vrot.slane %v2670_v48, %v2504_v30 }
 0x115   : > { %v448_v44 = vmul.f32 %v378_v45, %v2530_v60  ;;  %v879_v60 = vrot.slane %v2563_v58, %v2570_v54  ;;  %v942_v45 = vrot.slane %v2605_v11, %v2497_v26  ;;  %v1131_v58 = vrot.slane %v2670_v48, %v2512_v34 }
 0x117   : > { %571 = vperm.xlu0 %2186, %v448_v44   ;;  %574 = vperm.xlu1 %2187, %v449_v50  }
 0x118   : > { %v386_v59 = vpop.permute.xlu1 %385 }
 0x119   : > { %v450_v63 = vmul.f32 %v386_v59, %v2536_v2  ;;  %v788_v2 = vrot.slane %v238_v62, %v2508_v32  ;;  %v1145_v59 = vrot.slane %v2670_v48, %v2591_v5 }
 0x11b   : > { %577 = vperm.xlu0 %2186, %v450_v63   ;;  %839 = vbcast.lane.b32.xlu1 %v837_v55, 256  ;;  %v956_v55 = vrot.slane %v2605_v11, %v2508_v32 }
 0x11f   : > { %776 = vbcast.lane.b32.xlu0 %v774_v61, 256  ;;  %881 = vbcast.lane.b32.xlu1 %v879_v60, 256  ;;  %v970_v61 = vrot.slane %v2605_v11, %v2597_v8  ;;  %v1159_v60 = vrot.slane %v2670_v48, %v2570_v54 }
 0x123   : > { %783 = vbcast.lane.b32.xlu0 %v781_v1, 256  ;;  %895 = vbcast.lane.b32.xlu1 %v893_v3, 256  ;;  %v984_v3 = vrot.slane %v2605_v11, %v2611_v14  ;;  %v1026_v11 = vrot.slane %v2626_v21, %v2597_v8 }
 0x127   : > { %790 = vbcast.lane.b32.xlu0 %v788_v2, 256  ;;  %909 = vbcast.lane.b32.xlu1 %v907_v4, 256 }
 0x12b   : > { %797 = vbcast.lane.b32.xlu0 %v795_v6, 256  ;;  %923 = vbcast.lane.b32.xlu1 %v921_v7, 256  ;;  %v998_v6 = vrot.slane %v2626_v21, %v2497_v26 }
 0x12f   : > { %804 = vbcast.lane.b32.xlu0 %v802_v9, 256  ;;  %937 = vbcast.lane.b32.xlu1 %v935_v10, 256  ;;  %v1012_v10 = vrot.slane %v2626_v21, %v2508_v32 }
 0x133   : > { %811 = vbcast.lane.b32.xlu0 %v809_v12, 256  ;;  %951 = vbcast.lane.b32.xlu1 %v949_v13, 256 }
 0x137   : > { %818 = vbcast.lane.b32.xlu0 %v816_v15, 256  ;;  %965 = vbcast.lane.b32.xlu1 %v963_v16, 256  ;;  %v580_v15 = vand.u32 127, %v247_v24 }
 0x13b   : > { %825 = vbcast.lane.b32.xlu0 %v823_v17, 256  ;;  %979 = vbcast.lane.b32.xlu1 %v977_v18, 256  ;;  %v1040_v18 = vrot.slane %v2626_v21, %v2611_v14  ;;  %v2741_v21 = vsub.s32 %v580_v15, %v2494_v25 }
 0x13f   : > { %832 = vbcast.lane.b32.xlu0 %v830_v19, 256  ;;  %993 = vbcast.lane.b32.xlu1 %v991_v20, 256  ;;  %v585_v19 = vadd.s32 4294967288, %v580_v15 }
 0x141   : > { %v588_v24 = vsub.s32 %v585_v19, %v2494_v25 }
 0x143   : > { %846 = vbcast.lane.b32.xlu0 %v844_v22, 256  ;;  %1007 = vbcast.lane.b32.xlu1 %v1005_v23, 256  ;;  %v1054_v23 = vrot.slane %v2647_v36, %v2497_v26 }
 0x147   : > { %853 = vbcast.lane.b32.xlu0 %v851_v27, 256  ;;  %1021 = vbcast.lane.b32.xlu1 %v1019_v28, 256  ;;  %v592_v27 = vadd.s32 4294967280, %v580_v15  ;;  %v606_v28 = vadd.s32 4294967264, %v580_v15 }
 0x14b   : > { %860 = vbcast.lane.b32.xlu0 %v858_v29, 256  ;;  %1035 = vbcast.lane.b32.xlu1 %v1033_v31, 256  ;;  %v599_v29 = vadd.s32 4294967272, %v580_v15  ;;  %v620_v31 = vadd.s32 4294967248, %v580_v15 }
 0x14f   : > { %867 = vbcast.lane.b32.xlu0 %v865_v33, 256  ;;  %1049 = vbcast.lane.b32.xlu1 %v1047_v35, 256 }
 0x153   : > { %874 = vbcast.lane.b32.xlu0 %v872_v37, 256  ;;  %1063 = vbcast.lane.b32.xlu1 %v1061_v38, 256  ;;  %v613_v37 = vadd.s32 4294967256, %v580_v15  ;;  %v1068_v38 = vrot.slane %v2647_v36, %v2508_v32 }
 0x157   : > { %888 = vbcast.lane.b32.xlu0 %v886_v39, 256  ;;  %1077 = vbcast.lane.b32.xlu1 %v1075_v40, 256  ;;  %v595_v39 = vsub.s32 %v592_v27, %v2494_v25  ;;  %v627_v40 = vadd.s32 4294967240, %v580_v15 }
 0x15a   : > { %v2661_v43 = vpop.permute.xlu1 %487 }
 0x15b   : > { %902 = vbcast.lane.b32.xlu0 %v900_v41, 256  ;;  %1091 = vbcast.lane.b32.xlu1 %v1089_v42, 256  ;;  %v2672_v49 = vpop.permute.xlu0 %484  ;;  %v2747_v42 = vsub.s32 %v606_v28, %v2494_v25 }
 0x15e   : > { %v2674_v51 = vpop.permute.xlu1 %490 }
 0x15f   : > { %916 = vbcast.lane.b32.xlu0 %v914_v46, 256  ;;  %1105 = vbcast.lane.b32.xlu1 %v1103_v47, 256  ;;  %v602_v46 = vsub.s32 %v599_v29, %v2494_v25  ;;  %v2751_v47 = vsub.s32 %v620_v31, %v2494_v25  ;;  %v596_v15 = vrot.slane %v2674_v51, %v595_v39 }
 0x162   : > { %v2680_v56 = vpop.permute.xlu1 %496  ;;  %v2682_v57 = vpop.permute.xlu0 %493 }
 0x163   : > { %930 = vbcast.lane.b32.xlu0 %v928_v52, 256  ;;  %1119 = vbcast.lane.b32.xlu1 %v1117_v53, 256 }
 0x166   : > { %v2688_v50 = vpop.permute.xlu1 %502  ;;  %v2690_v44 = vpop.permute.xlu0 %499 }
 0x167   : > { %944 = vbcast.lane.b32.xlu0 %v942_v45, 256  ;;  %1133 = vbcast.lane.b32.xlu1 %v1131_v58, 256 }
 0x16a   : > { %v2696_v62 = vpop.permute.xlu1 %508  ;;  %v2698_v63 = vpop.permute.xlu0 %505 }
 0x16b   : > { %958 = vbcast.lane.b32.xlu0 %v956_v55, 256  ;;  %1147 = vbcast.lane.b32.xlu1 %v1145_v59, 256  ;;  %v637_v52 = vrot.slane %v2696_v62, %v2741_v21  ;;  %v2758_v55 = vsub.s32 %v613_v37, %v2494_v25 }
 0x16e   : > { %v2704_v0 = vpop.permute.xlu1 %514  ;;  %v512_v1 = vpop.permute.xlu0 %511 }
 0x16f   : > { %972 = vbcast.lane.b32.xlu0 %v970_v61, 256  ;;  %1161 = vbcast.lane.b32.xlu1 %v1159_v60, 256  ;;  %v641_v41 = vrot.slane %v512_v1, %v588_v24  ;;  %v646_v59 = vrot.slane %v2704_v0, %v595_v39  ;;  %v1082_v61 = vrot.slane %v2647_v36, %v2597_v8 }
 0x170   : > { %v2764_v60 = vsub.s32 %v627_v40, %v2494_v25  ;;  %v603_v25 = vrot.slane %v2682_v57, %v602_v46 }
 0x171   : > { %v642_v1 = vsel %vm590_vm0, %v641_v41, %v637_v52 }
 0x172   : > { %v2708_v2 = vpop.permute.xlu1 %520  ;;  %v2710_v4 = vpop.permute.xlu0 %517 }
 0x173   : > { %986 = vbcast.lane.b32.xlu0 %v984_v3, 256  ;;  %v651_v62 = vrot.slane %v2710_v4, %v602_v46 }
 0x176   : > { %v2714_v7 = vpop.permute.xlu1 %526  ;;  %v2716_v9 = vpop.permute.xlu0 %523 }
 0x177   : > { %1000 = vbcast.lane.b32.xlu0 %v998_v6, 256  ;;  %v589_v6 = vrot.slane %v2661_v43, %v588_v24  ;;  %v656_v43 = vrot.slane %v2708_v2, %v2747_v42  ;;  %v661_v51 = vrot.slane %v2716_v9, %v2758_v55  ;;  %v666_v52 = vrot.slane %v2714_v7, %v2751_v47 }
 0x17a   : > { %v533_v12 = vpop.permute.xlu1 %532  ;;  %v2720_v13 = vpop.permute.xlu0 %529 }
 0x17b   : > { %1014 = vbcast.lane.b32.xlu0 %v1012_v10, 256  ;;  %v676_v3 = vrot.slane %v533_v12, %v2741_v21  ;;  %v584_v10 = vrot.slane %v2672_v49, %v2741_v21  ;;  %v647_v49 = vsel %vm597_vm1, %v646_v59, %v642_v1 }
 0x17e   : > { %v2725_v16 = vpop.permute.xlu1 %538  ;;  %v536_v17 = vpop.permute.xlu0 %535 }
 0x17f   : > { %1028 = vbcast.lane.b32.xlu0 %v1026_v11, 256  ;;  %v680_v53 = vrot.slane %v536_v17, %v588_v24  ;;  %v685_v0 = vrot.slane %v2725_v16, %v595_v39  ;;  %v1096_v11 = vrot.slane %v2647_v36, %v2611_v14  ;;  %v652_v36 = vsel %vm604_vm2, %v651_v62, %v647_v49 }
 0x180   : > { %v657_v40 = vsel %vm611_vm3, %v656_v43, %v652_v36 }
 0x181   : > { %v681_v17 = vsel %vm590_vm0, %v680_v53, %v676_v3 }
 0x182   : > { %v2729_v20 = vpop.permute.xlu1 %544  ;;  %v2731_v22 = vpop.permute.xlu0 %541  ;;  %v686_v27 = vsel %vm597_vm1, %v685_v0, %v681_v17 }
 0x183   : > { %1042 = vbcast.lane.b32.xlu0 %v1040_v18, 256  ;;  %v690_v4 = vrot.slane %v2731_v22, %v602_v46  ;;  %v1110_v22 = vrot.slane %v2670_v48, %v2497_v26  ;;  %v695_v2 = vrot.slane %v2729_v20, %v2747_v42  ;;  %v617_v20 = vrot.slane %v2690_v44, %v2758_v55 }
 0x185   : > { %v691_v9 = vsel %vm604_vm2, %v690_v4, %v686_v27 }
 0x186   : > { %v2736_v33 = vpop.permute.xlu1 %550  ;;  %v2738_v35 = vpop.permute.xlu0 %547  ;;  %v696_v44 = vsel %vm611_vm3, %v695_v2, %v691_v9 }
 0x187   : > { %1056 = vbcast.lane.b32.xlu0 %v1054_v23, 256  ;;  %v591_v23 = vsel %vm590_vm0, %v589_v6, %v584_v10  ;;  %v700_v31 = vrot.slane %v2738_v35, %v2758_v55  ;;  %v705_v59 = vrot.slane %v2736_v33, %v2751_v47  ;;  %v631_v33 = vrot.slane %v2698_v63, %v2764_v60 }
 0x188   : > { %v598_v29 = vsel %vm597_vm1, %v596_v15, %v591_v23 }
 0x189   : > { %v701_v1 = vsel %vm618_vm4, %v700_v31, %v696_v44 }
 0x18a   : > { %v557_v45 = vpop.permute.xlu1 %556  ;;  %v2755_v58 = vpop.permute.xlu0 %553  ;;  %v706_v15 = vsel %vm625_vm5, %v705_v59, %v701_v1 }
 0x18b   : > { %1070 = vbcast.lane.b32.xlu0 %v1068_v38, 256  ;;  %v715_v16 = vrot.slane %v557_v45, %v2741_v21  ;;  %v671_v45 = vrot.slane %v2720_v13, %v2764_v60 }
 0x18e   : > { %v563_v18 = vpop.permute.xlu1 %562  ;;  %v560_v12 = vpop.permute.xlu0 %559 }
 0x18f   : > { %v719_v19 = vrot.slane %v560_v12, %v588_v24  ;;  %1084 = vbcast.lane.b32.xlu0 %v1082_v61, 256  ;;  %v724_v57 = vrot.slane %v563_v18, %v595_v39  ;;  %v610_v24 = vrot.slane %v2680_v56, %v2747_v42  ;;  %v605_v39 = vsel %vm604_vm2, %v603_v25, %v598_v29 }
 0x190   : > { %v662_v56 = vsel %vm618_vm4, %v661_v51, %v657_v40  ;;  %v624_v61 = vrot.slane %v2688_v50, %v2751_v47  ;;  %v1124_v50 = vrot.slane %v2670_v48, %v2508_v32 }
 0x191   : > { %v720_v28 = vsel %vm590_vm0, %v719_v19, %v715_v16  ;;  %v612_v7 = vsel %vm611_vm3, %v610_v24, %v605_v39  ;;  %v667_v10 = vsel %vm625_vm5, %v666_v52, %v662_v56 }
 0x192   : > { %v569_v37 = vpop.permute.xlu1 %568  ;;  %v566_v38 = vpop.permute.xlu0 %565  ;;  %v725_v35 = vsel %vm597_vm1, %v724_v57, %v720_v28  ;;  %v619_v13 = vsel %vm618_vm4, %v617_v20, %v612_v7  ;;  %v245_v57 = vld [vmem:[%s3301_s2 + $0x38] sm:$0xff] }
 0x193   : > { %v729_v41 = vrot.slane %v566_v38, %v602_v46  ;;  %1098 = vbcast.lane.b32.xlu0 %v1096_v11, 256  ;;  %v734_v53 = vrot.slane %v569_v37, %v2747_v42  ;;  %v710_v42 = vrot.slane %v2755_v58, %v2764_v60  ;;  %v672_v11 = vsel %vm632_vm6, %v671_v45, %v667_v10 }
 0x194   : > { %v626_v63 = vsel %vm625_vm5, %v624_v61, %v619_v13  ;;  %v1166_v23 = vrot.slane %v245_v57, %v2497_v26  ;;  %v1180_v27 = vrot.slane %v245_v57, %v2508_v32  ;;  %v1173_v24 = vrot.slane %v245_v57, %v2504_v30 }
 0x195   : > { %v730_v46 = vsel %vm604_vm2, %v729_v41, %v725_v35  ;;  %v633_v4 = vsel %vm632_vm6, %v631_v33, %v626_v63  ;;  %v1208_v31 = vrot.slane %v245_v57, %v2611_v14  ;;  %v1187_v37 = vrot.slane %v245_v57, %v2512_v34 }
 0x196   : > { %v575_v62 = vpop.permute.xlu1 %574  ;;  %v572_v3 = vpop.permute.xlu0 %571  ;;  %v735_v58 = vsel %vm611_vm3, %v734_v53, %v730_v46  ;;  %v752_v43 = vsel %vm751_vm7, %v672_v11, %v633_v4  ;;  %v1201_v38 = vrot.slane %v245_v57, %v2591_v5  ;;  %v1215_v30 = vrot.slane %v245_v57, %v2570_v54 }
 0x197   : > { %v739_v6 = vrot.slane %v572_v3, %v2758_v55  ;;  %1112 = vbcast.lane.b32.xlu0 %v1110_v22, 256  ;;  %v744_v0 = vrot.slane %v575_v62, %v2751_v47  ;;  %v711_v55 = vsel %vm632_vm6, %v710_v42, %v706_v15  ;;  %v1138_v47 = vrot.slane %v2670_v48, %v2597_v8 }
 0x198   : > { %v754_v16 = vsel %vm753_vm8, %v711_v55, %v752_v43 }
 0x199   : > { %v740_v25 = vsel %vm618_vm4, %v739_v6, %v735_v58 }
 0x19a   : > { %v578_v17 = vpop.permute.xlu0 %577  ;;  %v745_v12 = vsel %vm625_vm5, %v744_v0, %v740_v25  ;;  %v2858_v29 = vpop.permute.xlu1 %839 }
 0x19b   : > { %v749_v18 = vrot.slane %v578_v17, %v2764_v60  ;;  %1126 = vbcast.lane.b32.xlu0 %v1124_v50, 256  ;;  %v1152_v60 = vrot.slane %v2670_v48, %v2611_v14  ;;  %v1194_v48 = vrot.slane %v245_v57, %v2597_v8 }
 0x19d   : > { %v750_v49 = vsel %vm632_vm6, %v749_v18, %v745_v12 }
 0x19e   : > { %v2842_v19 = vpop.permute.xlu0 %776  ;;  %v756_v36 = vsel %vm755_vm9, %v750_v49, %v754_v16  ;;  %v2865_v26 = vpop.permute.xlu1 %881 }
 0x19f   : > { %v759_v51 = vsel %vm758_vm10, %v756_v36, 0.0  ;;  %1140 = vbcast.lane.b32.xlu0 %v1138_v47, 256 }
 0x1a0   : > { %760 = vadd.xlane.f32.xlu1 %v759_v51 }
 0x1a2   : > { %v2850_v22 = vpop.permute.xlu0 %783  ;;  %v2869_v20 = vpop.permute.xlu1 %895 }
 0x1a3   : > { %1154 = vbcast.lane.b32.xlu0 %v1152_v60, 256 }
 0x1a6   : > { %v2853_v2 = vpop.permute.xlu0 %790  ;;  %v2872_v40 = vpop.permute.xlu1 %909 }
 0x1a7   : > { %1168 = vbcast.lane.b32.xlu0 %v1166_v23, 256 }
 0x1aa   : > { %v2856_v28 = vpop.permute.xlu0 %797  ;;  %v2876_v52 = vpop.permute.xlu1 %923 }
 0x1ab   : > { %1182 = vbcast.lane.b32.xlu0 %v1180_v27, 256 }
 0x1ae   : > { %v2862_v9 = vpop.permute.xlu0 %804  ;;  %v2878_v56 = vpop.permute.xlu1 %937 }
 0x1af   : > { %1196 = vbcast.lane.b32.xlu0 %v1194_v48, 256 }
 0x1b1   : > { %1175 = vbcast.lane.b32.xlu1 %v1173_v24, 256 }
 0x1b2   : > { %v812_v32 = vpop.permute.xlu0 %811  ;;  %v2882_v5 = vpop.permute.xlu1 %951 }
 0x1b3   : > { %1210 = vbcast.lane.b32.xlu0 %v1208_v31, 256 }
 0x1b5   : > { %1189 = vbcast.lane.b32.xlu1 %v1187_v37, 256 }
 0x1b6   : > { %v819_v39 = vpop.permute.xlu0 %818  ;;  %v2884_v45 = vpop.permute.xlu1 %965 }
 0x1b9   : > { %1203 = vbcast.lane.b32.xlu1 %v1201_v38, 256 }
 0x1ba   : > { %v826_v8 = vpop.permute.xlu0 %825  ;;  %v2888_v59 = vpop.permute.xlu1 %979 }
 0x1bd   : > { %1217 = vbcast.lane.b32.xlu1 %v1215_v30, 256 }
 0x1be   : > { %v833_v14 = vpop.permute.xlu0 %832  ;;  %v2892_v46 = vpop.permute.xlu1 %993 }
 0x1c2   : > { %v2874_v41 = vpop.permute.xlu0 %846  ;;  %v2896_v7 = vpop.permute.xlu1 %1007 }
 0x1c6   : > { %v854_v34 = vpop.permute.xlu0 %853  ;;  %v2900_v42 = vpop.permute.xlu1 %1021 }
 0x1ca   : > { %v2880_v53 = vpop.permute.xlu0 %860  ;;  %v2904_v3 = vpop.permute.xlu1 %1035 }
 0x1ce   : > { %v868_v35 = vpop.permute.xlu0 %867  ;;  %v2908_v33 = vpop.permute.xlu1 %1049 }
 0x1d2   : > { %v2886_v54 = vpop.permute.xlu0 %874  ;;  %v2912_v50 = vpop.permute.xlu1 %1063 }
 0x1d6   : > { %v2890_v44 = vpop.permute.xlu0 %888  ;;  %v2916_v0 = vpop.permute.xlu1 %1077 }
 0x1da   : > { %v2894_v61 = vpop.permute.xlu0 %902  ;;  %v2920_v11 = vpop.permute.xlu1 %1091 }
 0x1de   : > { %v2898_v1 = vpop.permute.xlu0 %916  ;;  %v2924_v25 = vpop.permute.xlu1 %1105 }
 0x1e2   : > { %v2902_v62 = vpop.permute.xlu0 %930  ;;  %v2928_v55 = vpop.permute.xlu1 %1119 }
 0x1e6   : > { %v2906_v13 = vpop.permute.xlu0 %944  ;;  %v2932_v4 = vpop.permute.xlu1 %1133 }
 0x1ea   : > { %v2910_v6 = vpop.permute.xlu0 %958  ;;  %v2936_v47 = vpop.permute.xlu1 %1147 }
 0x1ee   : > { %v2914_v10 = vpop.permute.xlu0 %972  ;;  %v1162_v43 = vpop.permute.xlu1 %1161 }
 0x1f2   : > { %v2918_v58 = vpop.permute.xlu0 %986 }
 0x1f6   : > { %v2922_v15 = vpop.permute.xlu0 %1000 }
 0x1fa   : > { %v2926_v63 = vpop.permute.xlu0 %1014 }
 0x1fe   : > { %v2930_v17 = vpop.permute.xlu0 %1028 }
 0x202   : > { %v2934_v18 = vpop.permute.xlu0 %1042 }
 0x206   : > { %v2938_v12 = vpop.permute.xlu0 %1056 }
 0x20a   : > { %v2940_v16 = vpop.permute.xlu0 %1070 }
 0x20e   : > { %v2948_v57 = vpop.permute.xlu0 %1084 }
 0x212   : > { %v1099_v24 = vpop.permute.xlu0 %1098 }
 0x22d   : > { %v761_v49 = vpop.xlane.xlu1 %760 }
 0x22e   : > { %v2942_v36 = vmax.f32 %v761_v49, 0.0 }
 0x230   : > { %v1283_v51 = vmul.f32 %v2842_v19, %v2942_v36  ;;  %v1284_v60 = vmul.f32 %v2850_v22, %v2942_v36  ;;  %v1285_v23 = vmul.f32 %v2853_v2, %v2942_v36  ;;  %v1286_v27 = vmul.f32 %v2856_v28, %v2942_v36 }
 0x231   : > { %v1287_v48 = vmul.f32 %v2862_v9, %v2942_v36  ;;  %v1288_v19 = vmul.f32 %v812_v32, %v2942_v36  ;;  %v2958_v22 = vmul.f32 %v1099_v24, %v2942_v36  ;;  %v1289_v31 = vmul.f32 %v819_v39, %v2942_v36 }
 0x232   : > { %1412 = vperm.xlu0 %2186, %v1283_v51   ;;  %1415 = vperm.xlu1 %2187, %v1284_v60   ;;  %v1290_v2 = vmul.f32 %v826_v8, %v2942_v36  ;;  %v2963_v37 = vmul.f32 %v1162_v43, %v2942_v36  ;;  %v1291_v28 = vmul.f32 %v833_v14, %v2942_v36 }
 0x233   : > { %v1292_v9 = vmul.f32 %v2858_v29, %v2942_v36  ;;  %v1293_v32 = vmul.f32 %v2874_v41, %v2942_v36  ;;  %v1294_v38 = vmul.f32 %v854_v34, %v2942_v36  ;;  %v1295_v39 = vmul.f32 %v2880_v53, %v2942_v36 }
 0x234   : > { %v1296_v30 = vmul.f32 %v868_v35, %v2942_v36  ;;  %v1297_v8 = vmul.f32 %v2886_v54, %v2942_v36  ;;  %v1298_v29 = vmul.f32 %v2865_v26, %v2942_v36  ;;  %v1299_v14 = vmul.f32 %v2890_v44, %v2942_v36  ;;  %v1113_v35 = vpop.permute.xlu0 %1112 }
 0x235   : > { %v1300_v41 = vmul.f32 %v2869_v20, %v2942_v36  ;;  %v1301_v34 = vmul.f32 %v2894_v61, %v2942_v36  ;;  %v1302_v53 = vmul.f32 %v2872_v40, %v2942_v36  ;;  %v1303_v26 = vmul.f32 %v2898_v1, %v2942_v36 }
 0x236   : > { %1418 = vperm.xlu0 %2186, %v1285_v23   ;;  %1421 = vperm.xlu1 %2187, %v1286_v27   ;;  %v1304_v54 = vmul.f32 %v2876_v52, %v2942_v36  ;;  %v1305_v20 = vmul.f32 %v2902_v62, %v2942_v36  ;;  %v1306_v44 = vmul.f32 %v2878_v56, %v2942_v36 }
 0x237   : > { %v1307_v40 = vmul.f32 %v2906_v13, %v2942_v36  ;;  %v1308_v1 = vmul.f32 %v2882_v5, %v2942_v36  ;;  %v1309_v43 = vmul.f32 %v2910_v6, %v2942_v36  ;;  %v1315_v62 = vmul.f32 %v2922_v15, %v2942_v36 }
 0x238   : > { %v1127_v61 = vpop.permute.xlu0 %1126  ;;  %v1316_v56 = vmul.f32 %v2896_v7, %v2942_v36  ;;  %v1323_v13 = vmul.f32 %v2938_v12, %v2942_v36  ;;  %v1324_v5 = vmul.f32 %v2912_v50, %v2942_v36  ;;  %v1331_v51 = vmul.f32 %v1113_v35, %v2942_v36  ;;  %v1176_v7 = vpop.permute.xlu1 %1175 }
 0x239   : > { %v1332_v15 = vmul.f32 %v2928_v55, %v2942_v36  ;;  %v1340_v12 = vmul.f32 %v1176_v7, %v2942_v36  ;;  %v1317_v23 = vmul.f32 %v2926_v63, %v2942_v36  ;;  %v1325_v50 = vmul.f32 %v2940_v16, %v2942_v36 }
 0x23a   : > { %1424 = vperm.xlu0 %2186, %v1287_v48   ;;  %1427 = vperm.xlu1 %2187, %v1288_v19   ;;  %v1333_v27 = vmul.f32 %v1127_v61, %v2942_v36  ;;  %v1310_v19 = vmul.f32 %v2884_v45, %v2942_v36  ;;  %v1318_v63 = vmul.f32 %v2900_v42, %v2942_v36 }
 0x23b   : > { %v1326_v24 = vmul.f32 %v2916_v0, %v2942_v36  ;;  %v1334_v16 = vmul.f32 %v2932_v4, %v2942_v36  ;;  %v1311_v45 = vmul.f32 %v2914_v10, %v2942_v36  ;;  %v1327_v42 = vmul.f32 %v2948_v57, %v2942_v36 }
 0x23c   : > { %v1141_v52 = vpop.permute.xlu0 %1140  ;;  %v1320_v10 = vmul.f32 %v2904_v3, %v2942_v36  ;;  %v1336_v57 = vmul.f32 %v2936_v47, %v2942_v36 }
 0x23d   : > { %v1335_v0 = vmul.f32 %v1141_v52, %v2942_v36 }
 0x23e   : > { %1430 = vperm.xlu0 %2186, %v1289_v31   ;;  %1433 = vperm.xlu1 %2187, %v1290_v2   ;;  %v1190_v31 = vpop.permute.xlu1 %1189 }
 0x23f   : > { %v1342_v2 = vmul.f32 %v1190_v31, %v2942_v36 }
 0x240   : > { %v1155_v49 = vpop.permute.xlu0 %1154 }
 0x241   : > { %v1337_v3 = vmul.f32 %v1155_v49, %v2942_v36 }
 0x242   : > { %1436 = vperm.xlu0 %2186, %v1291_v28   ;;  %1439 = vperm.xlu1 %2187, %v1292_v9   ;;  %v1319_v28 = vmul.f32 %v2930_v17, %v2942_v36  ;;  %v1328_v17 = vmul.f32 %v2920_v11, %v2942_v36 }
 0x244   : > { %v1169_v6 = vpop.permute.xlu0 %1168 }
 0x245   : > { %v1339_v60 = vmul.f32 %v1169_v6, %v2942_v36 }
 0x246   : > { %1442 = vperm.xlu0 %2186, %v1293_v32   ;;  %1445 = vperm.xlu1 %2187, %v1294_v38   ;;  %v1312_v32 = vmul.f32 %v2888_v59, %v2942_v36  ;;  %v1204_v38 = vpop.permute.xlu1 %1203  ;;  %v1313_v59 = vmul.f32 %v2918_v58, %v2942_v36  ;;  %v1322_v58 = vmul.f32 %v2908_v33, %v2942_v36 }
 0x248   : > { %v1183_v48 = vpop.permute.xlu0 %1182 }
 0x249   : > { %v1341_v55 = vmul.f32 %v1183_v48, %v2942_v36 }
 0x24a   : > { %1448 = vperm.xlu0 %2186, %v1295_v39   ;;  %1451 = vperm.xlu1 %2187, %v1296_v30   ;;  %v1344_v39 = vmul.f32 %v1204_v38, %v2942_v36  ;;  %v1321_v30 = vmul.f32 %v2934_v18, %v2942_v36  ;;  %v1330_v18 = vmul.f32 %v2924_v25, %v2942_v36 }
 0x24c   : > { %v1197_v9 = vpop.permute.xlu0 %1196 }
 0x24d   : > { %v1343_v4 = vmul.f32 %v1197_v9, %v2942_v36 }
 0x24e   : > { %1454 = vperm.xlu0 %2186, %v1297_v8   ;;  %1457 = vperm.xlu1 %2187, %v1298_v29   ;;  %v1314_v8 = vmul.f32 %v2892_v46, %v2942_v36  ;;  %v1218_v29 = vpop.permute.xlu1 %1217 }
 0x250   : > { %v1211_v11 = vpop.permute.xlu0 %1210 }
 0x251   : > { %v1345_v47 = vmul.f32 %v1211_v11, %v2942_v36 }
 0x252   : > { %1460 = vperm.xlu0 %2186, %v1299_v14   ;;  %1463 = vperm.xlu1 %2187, %v1300_v41   ;;  %v1346_v14 = vmul.f32 %v1218_v29, %v2942_v36 }
 0x256   : > { %1466 = vperm.xlu0 %2186, %v1301_v34   ;;  %1469 = vperm.xlu1 %2187, %v1302_v53  }
 0x25a   : > { %1472 = vperm.xlu0 %2186, %v1303_v26   ;;  %1475 = vperm.xlu1 %2187, %v1304_v54  }
 0x25e   : > { %1478 = vperm.xlu0 %2186, %v1305_v20   ;;  %1481 = vperm.xlu1 %2187, %v1306_v44  }
 0x262   : > { %1484 = vperm.xlu0 %2186, %v1307_v40   ;;  %1487 = vperm.xlu1 %2187, %v1308_v1  }
 0x266   : > { %1490 = vperm.xlu0 %2186, %v1309_v43   ;;  %1508 = vperm.xlu1 %2187, %v1315_v62  }
 0x26a   : > { %1511 = vperm.xlu0 %2186, %v1316_v56   ;;  %1532 = vperm.xlu1 %2187, %v1323_v13  }
 0x26e   : > { %1535 = vperm.xlu0 %2186, %v1324_v5   ;;  %1556 = vperm.xlu1 %2187, %v1331_v51  }
 0x272   : > { %1559 = vperm.xlu0 %2186, %v1332_v15   ;;  %1580 = vperm.xlu1 %2187, %v1339_v60  }
 0x276   : > { %1583 = vperm.xlu0 %2186, %v1340_v12   ;;  %1514 = vperm.xlu1 %2187, %v1317_v23  }
 0x27a   : > { %1538 = vperm.xlu0 %2186, %v1325_v50   ;;  %1562 = vperm.xlu1 %2187, %v1333_v27  }
 0x27e   : > { %1586 = vperm.xlu0 %2186, %v1341_v55   ;;  %1493 = vperm.xlu1 %2187, %v1310_v19  }
 0x282   : > { %1517 = vperm.xlu0 %2186, %v1318_v63   ;;  %1541 = vperm.xlu1 %2187, %v1326_v24  }
 0x286   : > { %1565 = vperm.xlu0 %2186, %v1334_v16   ;;  %1589 = vperm.xlu1 %2187, %v1342_v2  }
 0x28a   : > { %1496 = vperm.xlu0 %2186, %v1311_v45   ;;  %1520 = vperm.xlu1 %2187, %v1319_v28  }
 0x28e   : > { %1544 = vperm.xlu0 %2186, %v1327_v42   ;;  %1568 = vperm.xlu1 %2187, %v1335_v0  }
 0x292   : > { %1592 = vperm.xlu0 %2186, %v1343_v4   ;;  %1499 = vperm.xlu1 %2187, %v1312_v32  }
 0x296   : > { %1523 = vperm.xlu0 %2186, %v1320_v10   ;;  %1547 = vperm.xlu1 %2187, %v1328_v17  }
 0x29a   : > { %1571 = vperm.xlu0 %2186, %v1336_v57   ;;  %1595 = vperm.xlu1 %2187, %v1344_v39  }
 0x29e   : > { %1502 = vperm.xlu0 %2186, %v1313_v59   ;;  %1526 = vperm.xlu1 %2187, %v1321_v30  }
 0x2a2   : > { %1550 = vperm.xlu0 %2186, %v2958_v22   ;;  %1574 = vperm.xlu1 %2187, %v1337_v3  }
 0x2a6   : > { %1598 = vperm.xlu0 %2186, %v1345_v47   ;;  %1505 = vperm.xlu1 %2187, %v1314_v8  }
 0x2aa   : > { %1529 = vperm.xlu0 %2186, %v1322_v58   ;;  %1553 = vperm.xlu1 %2187, %v1330_v18  }
 0x2ae   : > { %1577 = vperm.xlu0 %2186, %v2963_v37   ;;  %1601 = vperm.xlu1 %2187, %v1346_v14  }
 0x2b1   : > { %v1413_v22 = vpop.permute.xlu0 %1412  ;;  %v1416_v41 = vpop.permute.xlu1 %1415 }
 0x2b2   : > { %v1610_v53 = vrot.slane %v1416_v41, %v2741_v21  ;;  %v1606_v35 = vrot.slane %v1413_v22, %v2741_v21 }
 0x2b4   : > { %v1859_v54 = vsel %vm751_vm7, %v1610_v53, %v1606_v35 }
 0x2b5   : > { %v1419_v34 = vpop.permute.xlu0 %1418  ;;  %v1422_v46 = vpop.permute.xlu1 %1421 }
 0x2b6   : > { %v1614_v26 = vrot.slane %v1419_v34, %v2741_v21  ;;  %v1618_v20 = vrot.slane %v1422_v46, %v2741_v21 }
 0x2b8   : > { %v1860_v37 = vsel %vm753_vm8, %v1614_v26, %v1859_v54 }
 0x2b9   : > { %v1425_v33 = vpop.permute.xlu0 %1424  ;;  %v1428_v25 = vpop.permute.xlu1 %1427  ;;  %v1861_v1 = vsel %vm755_vm9, %v1618_v20, %v1860_v37 }
 0x2ba   : > { %v1622_v44 = vrot.slane %v1425_v33, %v2741_v21  ;;  %v1626_v40 = vrot.slane %v1428_v25, %v2741_v21 }
 0x2bc   : > { %v1863_v43 = vsel %vm1862_vm11, %v1622_v44, %v1861_v1 }
 0x2bd   : > { %v1431_v36 = vpop.permute.xlu0 %1430  ;;  %v1434_v61 = vpop.permute.xlu1 %1433  ;;  %v1865_v6 = vsel %vm1864_vm12, %v1626_v40, %v1863_v43 }
 0x2be   : > { %v1630_v62 = vrot.slane %v1431_v36, %v2741_v21  ;;  %v1634_v5 = vrot.slane %v1434_v61, %v2741_v21 }
 0x2c0   : > { %v1867_v7 = vsel %vm1866_vm13, %v1630_v62, %v1865_v6 }
 0x2c1   : > { %v1437_v52 = vpop.permute.xlu0 %1436  ;;  %v1440_v56 = vpop.permute.xlu1 %1439  ;;  %v1869_v48 = vsel %vm1868_vm14, %v1634_v5, %v1867_v7 }
 0x2c2   : > { %v1642_v13 = vrot.slane %v1440_v56, %v2741_v21  ;;  %v1638_v49 = vrot.slane %v1437_v52, %v2741_v21  ;;  %v1928_v16 = vsel %vm1927_vm15, %v1869_v48, 0.0 }
 0x2c4   : > { %v1870_v12 = vsel %vm751_vm7, %v1642_v13, %v1638_v49 }
 0x2c5   : > { %v1443_v51 = vpop.permute.xlu0 %1442  ;;  %v1446_v15 = vpop.permute.xlu1 %1445 }
 0x2c6   : > { %v1646_v60 = vrot.slane %v1443_v51, %v2741_v21  ;;  %v1650_v23 = vrot.slane %v1446_v15, %v2741_v21 }
 0x2c8   : > { %v1871_v50 = vsel %vm753_vm8, %v1646_v60, %v1870_v12 }
 0x2c9   : > { %v1449_v27 = vpop.permute.xlu0 %1448  ;;  %v1452_v55 = vpop.permute.xlu1 %1451  ;;  %v1872_v24 = vsel %vm755_vm9, %v1650_v23, %v1871_v50 }
 0x2ca   : > { %v1654_v19 = vrot.slane %v1449_v27, %v2741_v21  ;;  %v1658_v63 = vrot.slane %v1452_v55, %v2741_v21 }
 0x2cc   : > { %v1873_v31 = vsel %vm1862_vm11, %v1654_v19, %v1872_v24 }
 0x2cd   : > { %1929 = vadd.xlane.f32.xlu0 %v1928_v16  ;;  %v1455_v2 = vpop.permute.xlu0 %1454  ;;  %v1458_v45 = vpop.permute.xlu1 %1457  ;;  %v1874_v0 = vsel %vm1864_vm12, %v1658_v63, %v1873_v31 }
 0x2ce   : > { %v1662_v28 = vrot.slane %v1455_v2, %v2741_v21  ;;  %v1666_v42 = vrot.slane %v1458_v45, %v2741_v21 }
 0x2d0   : > { %v1875_v9 = vsel %vm1866_vm13, %v1662_v28, %v1874_v0 }
 0x2d1   : > { %v1461_v4 = vpop.permute.xlu0 %1460  ;;  %v1876_v32 = vsel %vm1868_vm14, %v1666_v42, %v1875_v9  ;;  %v1464_v10 = vpop.permute.xlu1 %1463 }
 0x2d2   : > { %v1931_v17 = vsel %vm1927_vm15, %v1876_v32, 0.0  ;;  %v1674_v38 = vrot.slane %v1464_v10, %v2741_v21  ;;  %v1670_v57 = vrot.slane %v1461_v4, %v2741_v21 }
 0x2d3   : > { %1932 = vadd.xlane.f32.xlu1 %v1931_v17 }
 0x2d4   : > { %v1877_v3 = vsel %vm751_vm7, %v1674_v38, %v1670_v57 }
 0x2d5   : > { %v1467_v39 = vpop.permute.xlu0 %1466  ;;  %v1470_v59 = vpop.permute.xlu1 %1469 }
 0x2d6   : > { %v1678_v30 = vrot.slane %v1467_v39, %v2741_v21  ;;  %v1682_v11 = vrot.slane %v1470_v59, %v2741_v21 }
 0x2d8   : > { %v1878_v47 = vsel %vm753_vm8, %v1678_v30, %v1877_v3 }
 0x2d9   : > { %v1473_v8 = vpop.permute.xlu0 %1472  ;;  %v1476_v58 = vpop.permute.xlu1 %1475  ;;  %v1879_v14 = vsel %vm755_vm9, %v1682_v11, %v1878_v47 }
 0x2da   : > { %v1686_v18 = vrot.slane %v1473_v8, %v2741_v21  ;;  %v1690_v29 = vrot.slane %v1476_v58, %v2741_v21 }
 0x2dc   : > { %v1880_v22 = vsel %vm1862_vm11, %v1686_v18, %v1879_v14 }
 0x2dd   : > { %v1479_v41 = vpop.permute.xlu0 %1478  ;;  %v1482_v34 = vpop.permute.xlu1 %1481  ;;  %v1881_v35 = vsel %vm1864_vm12, %v1690_v29, %v1880_v22 }
 0x2de   : > { %v1694_v46 = vrot.slane %v1479_v41, %v2741_v21  ;;  %v1698_v53 = vrot.slane %v1482_v34, %v2741_v21 }
 0x2e0   : > { %v1882_v33 = vsel %vm1866_vm13, %v1694_v46, %v1881_v35 }
 0x2e1   : > { %v1485_v26 = vpop.permute.xlu0 %1484  ;;  %v1883_v25 = vsel %vm1868_vm14, %v1698_v53, %v1882_v33  ;;  %v1488_v54 = vpop.permute.xlu1 %1487 }
 0x2e2   : > { %v1934_v20 = vsel %vm1927_vm15, %v1883_v25, 0.0  ;;  %v1706_v31 = vrot.slane %v1488_v54, %v2741_v21  ;;  %v1702_v16 = vrot.slane %v1485_v26, %v2741_v21 }
 0x2e3   : > { %1935 = vadd.xlane.f32.xlu0 %v1934_v20 }
 0x2e4   : > { %v1884_v0 = vsel %vm751_vm7, %v1706_v31, %v1702_v16 }
 0x2e5   : > { %v1491_v36 = vpop.permute.xlu0 %1490  ;;  %v1509_v37 = vpop.permute.xlu1 %1508 }
 0x2e6   : > { %v1710_v45 = vrot.slane %v1491_v36, %v2741_v21  ;;  %v1734_v9 = vrot.slane %v1509_v37, %v2741_v21 }
 0x2e8   : > { %v1885_v17 = vsel %vm753_vm8, %v1710_v45, %v1884_v0 }
 0x2e9   : > { %v1512_v44 = vpop.permute.xlu0 %1511  ;;  %v1533_v61 = vpop.permute.xlu1 %1532 }
 0x2ea   : > { %v1738_v28 = vrot.slane %v1512_v44, %v2741_v21  ;;  %v1766_v59 = vrot.slane %v1533_v61, %v2741_v21 }
 0x2ec   : > { %v1891_v47 = vsel %vm751_vm7, %v1738_v28, %v1734_v9 }
 0x2ed   : > { %v1536_v40 = vpop.permute.xlu0 %1535  ;;  %v1557_v1 = vpop.permute.xlu1 %1556 }
 0x2ee   : > { %v1770_v4 = vrot.slane %v1536_v40, %v2741_v21  ;;  %v1798_v30 = vrot.slane %v1557_v1, %v2741_v21 }
 0x2f0   : > { %v1898_v14 = vsel %vm751_vm7, %v1770_v4, %v1766_v59 }
 0x2f1   : > { %v1560_v52 = vpop.permute.xlu0 %1559  ;;  %v1581_v43 = vpop.permute.xlu1 %1580 }
 0x2f2   : > { %v1802_v32 = vrot.slane %v1560_v52, %v2741_v21  ;;  %v1830_v8 = vrot.slane %v1581_v43, %v2741_v21 }
 0x2f4   : > { %v1905_v22 = vsel %vm751_vm7, %v1802_v32, %v1798_v30 }
 0x2f5   : > { %v1584_v62 = vpop.permute.xlu0 %1583  ;;  %v1515_v56 = vpop.permute.xlu1 %1514 }
 0x2f6   : > { %v1742_v38 = vrot.slane %v1515_v56, %v2741_v21  ;;  %v1834_v57 = vrot.slane %v1584_v62, %v2741_v21 }
 0x2f8   : > { %v1892_v53 = vsel %vm753_vm8, %v1742_v38, %v1891_v47  ;;  %v1912_v35 = vsel %vm751_vm7, %v1834_v57, %v1830_v8 }
 0x2f9   : > { %v1539_v13 = vpop.permute.xlu0 %1538  ;;  %v1563_v49 = vpop.permute.xlu1 %1562 }
 0x2fa   : > { %v1774_v39 = vrot.slane %v1539_v13, %v2741_v21  ;;  %v1806_v3 = vrot.slane %v1563_v49, %v2741_v21 }
 0x2fc   : > { %v1899_v33 = vsel %vm753_vm8, %v1774_v39, %v1898_v14  ;;  %v1906_v25 = vsel %vm753_vm8, %v1806_v3, %v1905_v22 }
 0x2fd   : > { %v1587_v5 = vpop.permute.xlu0 %1586  ;;  %v1494_v51 = vpop.permute.xlu1 %1493 }
 0x2fe   : > { %v1838_v11 = vrot.slane %v1587_v5, %v2741_v21  ;;  %v1714_v58 = vrot.slane %v1494_v51, %v2741_v21 }
 0x300   : > { %v1913_v54 = vsel %vm753_vm8, %v1838_v11, %v1912_v35  ;;  %v1886_v37 = vsel %vm755_vm9, %v1714_v58, %v1885_v17 }
 0x301   : > { %v1518_v6 = vpop.permute.xlu0 %1517  ;;  %v1542_v15 = vpop.permute.xlu1 %1541 }
 0x302   : > { %v1746_v18 = vrot.slane %v1518_v6, %v2741_v21  ;;  %v1778_v41 = vrot.slane %v1542_v15, %v2741_v21 }
 0x304   : > { %v1893_v44 = vsel %vm755_vm9, %v1746_v18, %v1892_v53  ;;  %v1900_v52 = vsel %vm755_vm9, %v1778_v41, %v1899_v33 }
 0x305   : > { %v3108_v60 = vpop.permute.xlu0 %1565  ;;  %v3110_v7 = vpop.permute.xlu1 %1589 }
 0x306   : > { %v1810_v43 = vrot.slane %v3108_v60, %v2741_v21  ;;  %v1842_v49 = vrot.slane %v3110_v7, %v2741_v21 }
 0x308   : > { %v1907_v4 = vsel %vm755_vm9, %v1810_v43, %v1906_v25  ;;  %v1914_v17 = vsel %vm755_vm9, %v1842_v49, %v1913_v54  ;;  %v2221_v43 = vld [vmem:[%s2471_s11 + $0x8] sm:$0xff] }
 0x309   : > { %v1497_v12 = vpop.permute.xlu0 %1496  ;;  %v1521_v23 = vpop.permute.xlu1 %1520 }
 0x30a   : > { %v1718_v34 = vrot.slane %v1497_v12, %v2741_v21  ;;  %v1750_v20 = vrot.slane %v1521_v23, %v2741_v21 }
 0x30c   : > { %v1887_v62 = vsel %vm1862_vm11, %v1718_v34, %v1886_v37  ;;  %v1894_v15 = vsel %vm1862_vm11, %v1750_v20, %v1893_v44 }
 0x30d   : > { %v3112_v50 = vpop.permute.xlu0 %1544  ;;  %v3114_v27 = vpop.permute.xlu1 %1568 }
 0x30e   : > { %v1782_v61 = vrot.slane %v3112_v50, %v2741_v21  ;;  %v1814_v60 = vrot.slane %v3114_v27, %v2741_v21 }
 0x310   : > { %v1901_v50 = vsel %vm1862_vm11, %v1782_v61, %v1900_v52  ;;  %v1908_v38 = vsel %vm1862_vm11, %v1814_v60, %v1907_v4 }
 0x311   : > { %v3116_v48 = vpop.permute.xlu0 %1592  ;;  %v1500_v55 = vpop.permute.xlu1 %1499 }
 0x312   : > { %v1722_v26 = vrot.slane %v1500_v55, %v2741_v21  ;;  %v1846_v7 = vrot.slane %v3116_v48, %v2741_v21 }
 0x314   : > { %v1888_v5 = vsel %vm1864_vm12, %v1722_v26, %v1887_v62  ;;  %v1915_v59 = vsel %vm1862_vm11, %v1846_v7, %v1914_v17 }
 0x315   : > { %v1524_v19 = vpop.permute.xlu0 %1523  ;;  %v3118_v63 = vpop.permute.xlu1 %1547 }
 0x316   : > { %v1754_v40 = vrot.slane %v1524_v19, %v2741_v21  ;;  %v1786_v56 = vrot.slane %v3118_v63, %v2741_v21 }
 0x318   : > { %v1895_v55 = vsel %vm1864_vm12, %v1754_v40, %v1894_v15  ;;  %v1902_v31 = vsel %vm1864_vm12, %v1786_v56, %v1901_v50  ;;  %v2225_v50 = vld [vmem:[%s2471_s11 + $0x28] sm:$0xff] }
 0x319   : > { %v3120_v24 = vpop.permute.xlu0 %1571  ;;  %v3124_v2 = vpop.permute.xlu1 %1595 }
 0x31a   : > { %v1818_v16 = vrot.slane %v3120_v24, %v2741_v21 }
 0x31c   : > { %v1909_v30 = vsel %vm1864_vm12, %v1818_v16, %v1908_v38 }
 0x31d   : > { %v1503_v42 = vpop.permute.xlu0 %1502  ;;  %v1527_v10 = vpop.permute.xlu1 %1526 }
 0x31e   : > { %v1726_v36 = vrot.slane %v1503_v42, %v2741_v21  ;;  %v1758_v51 = vrot.slane %v1527_v10, %v2741_v21  ;;  %v1850_v42 = vrot.slane %v3124_v2, %v2741_v21 }
 0x320   : > { %v1889_v23 = vsel %vm1866_vm13, %v1726_v36, %v1888_v5  ;;  %v1896_v9 = vsel %vm1866_vm13, %v1758_v51, %v1895_v55  ;;  %v1916_v8 = vsel %vm1864_vm12, %v1850_v42, %v1915_v59  ;;  %v2223_v5 = vld [vmem:[%s2471_s11 + $0x18] sm:$0xff] }
 0x321   : > { %v1551_v29 = vpop.permute.xlu0 %1550  ;;  %v1575_v46 = vpop.permute.xlu1 %1574 }
 0x322   : > { %v1790_v12 = vrot.slane %v1551_v29, %v2741_v21  ;;  %v1822_v48 = vrot.slane %v1575_v46, %v2741_v21 }
 0x324   : > { %v1903_v24 = vsel %vm1866_vm13, %v1790_v12, %v1902_v31  ;;  %v1910_v18 = vsel %vm1866_vm13, %v1822_v48, %v1909_v30  ;;  %v2224_v12 = vld [vmem:[%s2471_s11 + $0x20] sm:$0xff] }
 0x325   : > { %v1599_v1 = vpop.permute.xlu0 %1598  ;;  %v1506_v13 = vpop.permute.xlu1 %1505 }
 0x326   : > { %v1730_v6 = vrot.slane %v1506_v13, %v2741_v21  ;;  %v1854_v32 = vrot.slane %v1599_v1, %v2741_v21  ;;  %v2220_v1 = vld [vmem:[%s2471_s11] sm:$0xff]  ;;  %v2222_v13 = vld [vmem:[%s2471_s11 + $0x10] sm:$0xff] }
 0x328   : > { %v1890_v63 = vsel %vm1868_vm14, %v1730_v6, %v1889_v23  ;;  %v1917_v29 = vsel %vm1866_vm13, %v1854_v32, %v1916_v8  ;;  %v2226_v8 = vld [vmem:[%s2471_s11 + $0x30] sm:$0xff] }
 0x329   : > { %v1530_v19 = vpop.permute.xlu0 %1529  ;;  %v1554_v27 = vpop.permute.xlu1 %1553  ;;  %v1937_v28 = vsel %vm1927_vm15, %v1890_v63, 0.0 }
 0x32a   : > { %v1762_v45 = vrot.slane %v1530_v19, %v2741_v21  ;;  %v1794_v0 = vrot.slane %v1554_v27, %v2741_v21  ;;  %1938 = vadd.xlane.f32.xlu0 %v1937_v28 }
 0x32c   : > { %v1897_v10 = vsel %vm1868_vm14, %v1762_v45, %v1896_v9  ;;  %v1904_v57 = vsel %vm1868_vm14, %v1794_v0, %v1903_v24 }
 0x32d   : > { %v1578_v2 = vpop.permute.xlu0 %1577  ;;  %v1940_v39 = vsel %vm1927_vm15, %v1897_v10, 0.0  ;;  %v1602_v3 = vpop.permute.xlu1 %1601  ;;  %v1943_v47 = vsel %vm1927_vm15, %v1904_v57, 0.0 }
 0x32e   : > { %v1826_v11 = vrot.slane %v1578_v2, %v2741_v21  ;;  %1941 = vadd.xlane.f32.xlu1 %v1940_v39  ;;  %v1858_v58 = vrot.slane %v1602_v3, %v2741_v21  ;;  %1944 = vadd.xlane.f32.xlu0 %v1943_v47 }
 0x330   : > { %v1911_v14 = vsel %vm1868_vm14, %v1826_v11, %v1910_v18  ;;  %v1918_v22 = vsel %vm1868_vm14, %v1858_v58, %v1917_v29  ;;  %v2227_v18 = vld [vmem:[%s2471_s11 + $0x38] sm:$0xff] }
 0x331   : > { %v1946_v41 = vsel %vm1927_vm15, %v1911_v14, 0.0  ;;  %v1949_v34 = vsel %vm1927_vm15, %v1918_v22, 0.0 }
 0x332   : > { %1947 = vadd.xlane.f32.xlu1 %v1946_v41  ;;  %1950 = vadd.xlane.f32.xlu0 %v1949_v34  ;;  %v2228_v41 = vld [vmem:[%s2471_s11 + $0x40] sm:$0xff] }
 0x35a   : > { %v1930_v46 = vpop.xlane.xlu0 %1929 }
 0x35b   : > { %v1952_v53 = vsub.f32 0.0, %v1930_v46  ;;  %v2229_v46 = vld [vmem:[%s2471_s11 + $0x48] sm:$0xff] }
 0x35d   : > { %v1960_v35 = vmul.f32 1.442695, %v1952_v53 }
 0x35f   : > { %2188 = vpow2.f32 %v1960_v35  ;;  %v2230_v35 = vld [vmem:[%s2471_s11 + $0x50] sm:$0xff] }
 0x360   : > { %v1933_v21 = vpop.xlane.xlu1 %1932 }
 0x361   : > { %v1953_v33 = vsub.f32 0.0, %v1933_v21 }
 0x363   : > { %v1962_v26 = vmul.f32 1.442695, %v1953_v33  ;;  %v2231_v33 = vld [vmem:[%s2471_s11 + $0x58] sm:$0xff] }
 0x365   : > { %2190 = vpow2.f32 %v1962_v26 }
 0x369   : > { %v2189_v25 = vpop.eup %2188 }
 0x36a   : > { %v1976_v54 = vadd.f32 1.0, %v2189_v25 }
 0x36c   : > { %2192 = vrcp.f32 %v1976_v54 }
 0x36f   : > { %v2191_v20 = vpop.eup %2190 }
 0x370   : > { %v1977_v36 = vadd.f32 1.0, %v2191_v20  ;;  %v1936_v37 = vpop.xlane.xlu0 %1935  ;;  %v2232_v20 = vld [vmem:[%s2471_s11 + $0x60] sm:$0xff] }
 0x371   : > { %v1954_v44 = vsub.f32 0.0, %v1936_v37  ;;  %v2233_v37 = vld [vmem:[%s2471_s11 + $0x68] sm:$0xff] }
 0x372   : > { %2194 = vrcp.f32 %v1977_v36 }
 0x373   : > { %v1964_v61 = vmul.f32 1.442695, %v1954_v44 }
 0x375   : > { %2196 = vpow2.f32 %v1964_v61  ;;  %v2234_v61 = vld [vmem:[%s2471_s11 + $0x70] sm:$0xff] }
 0x376   : > { %v2193_v40 = vpop.eup %2192 }
 0x377   : > { %v2000_v52 = vmul.f32 %v2220_v1, %v2193_v40  ;;  %v2001_v62 = vmul.f32 %v2221_v43, %v2193_v40  ;;  %v2235_v1 = vld [vmem:[%s2471_s11 + $0x78] sm:$0xff] }
 0x379   : > { %2016 = vst [vmem:[%s3216_s7] sm:$0xff] %v2000_v52  ;;  %2017 = vst [vmem:[%s3216_s7 + $0x8] sm:$0xff] %v2001_v62 }
 0x37c   : > { %v2195_v56 = vpop.eup %2194 }
 0x37d   : > { %v2002_v49 = vmul.f32 %v2222_v13, %v2195_v56  ;;  %v2003_v51 = vmul.f32 %v2223_v5, %v2195_v56 }
 0x37f   : > { %v2197_v6 = vpop.eup %2196  ;;  %2018 = vst [vmem:[%s3216_s7 + $0x10] sm:$0xff] %v2002_v49  ;;  %2019 = vst [vmem:[%s3216_s7 + $0x18] sm:$0xff] %v2003_v51 }
 0x380   : > { %v1978_v15 = vadd.f32 1.0, %v2197_v6 }
 0x382   : > { %2198 = vrcp.f32 %v1978_v15 }
 0x38c   : > { %v2199_v60 = vpop.eup %2198 }
 0x38d   : > { %v2004_v23 = vmul.f32 %v2224_v12, %v2199_v60  ;;  %v2005_v7 = vmul.f32 %v2225_v50, %v2199_v60 }
 0x38f   : > { %2020 = vst [vmem:[%s3216_s7 + $0x20] sm:$0xff] %v2004_v23  ;;  %2021 = vst [vmem:[%s3216_s7 + $0x28] sm:$0xff] %v2005_v7 }
 0x3b7   : > { %v1939_v55 = vpop.xlane.xlu0 %1938 }
 0x3b8   : > { %v1955_v19 = vsub.f32 0.0, %v1939_v55 }
 0x3ba   : > { %v1966_v63 = vmul.f32 1.442695, %v1955_v19 }
 0x3bb   : > { %v1942_v31 = vpop.xlane.xlu1 %1941  ;;  %v1945_v27 = vpop.xlane.xlu0 %1944 }
 0x3bc   : > { %v1956_v16 = vsub.f32 0.0, %v1942_v31  ;;  %2200 = vpow2.f32 %v1966_v63  ;;  %v1957_v45 = vsub.f32 0.0, %v1945_v27 }
 0x3be   : > { %v1968_v28 = vmul.f32 1.442695, %v1956_v16  ;;  %v1970_v42 = vmul.f32 1.442695, %v1957_v45 }
 0x3bf   : > { %v1948_v48 = vpop.xlane.xlu1 %1947  ;;  %v1951_v9 = vpop.xlane.xlu0 %1950 }
 0x3c0   : > { %2202 = vpow2.f32 %v1968_v28  ;;  %v1958_v0 = vsub.f32 0.0, %v1948_v48  ;;  %v1959_v4 = vsub.f32 0.0, %v1951_v9 }
 0x3c1   : > { %2204 = vpow2.f32 %v1970_v42 }
 0x3c2   : > { %v1972_v32 = vmul.f32 1.442695, %v1958_v0  ;;  %v1974_v24 = vmul.f32 1.442695, %v1959_v4 }
 0x3c4   : > { %2206 = vpow2.f32 %v1972_v32 }
 0x3c5   : > { %2208 = vpow2.f32 %v1974_v24 }
 0x3c6   : > { %v2201_v10 = vpop.eup %2200 }
 0x3c7   : > { %v1979_v17 = vadd.f32 1.0, %v2201_v10 }
 0x3c9   : > { %2210 = vrcp.f32 %v1979_v17 }
 0x3ca   : > { %v2203_v38 = vpop.eup %2202 }
 0x3cb   : > { %v2205_v2 = vpop.eup %2204  ;;  %v1980_v57 = vadd.f32 1.0, %v2203_v38 }
 0x3cc   : > { %v1981_v39 = vadd.f32 1.0, %v2205_v2 }
 0x3cd   : > { %2212 = vrcp.f32 %v1980_v57 }
 0x3ce   : > { %v2207_v59 = vpop.eup %2206  ;;  %2214 = vrcp.f32 %v1981_v39 }
 0x3cf   : > { %v2209_v30 = vpop.eup %2208  ;;  %v1982_v3 = vadd.f32 1.0, %v2207_v59 }
 0x3d0   : > { %v1983_v11 = vadd.f32 1.0, %v2209_v30 }
 0x3d1   : > { %2216 = vrcp.f32 %v1982_v3 }
 0x3d2   : > { %2218 = vrcp.f32 %v1983_v11 }
 0x3d3   : > { %v2211_v47 = vpop.eup %2210 }
 0x3d4   : > { %v2006_v58 = vmul.f32 %v2226_v8, %v2211_v47  ;;  %v2007_v29 = vmul.f32 %v2227_v18, %v2211_v47 }
 0x3d6   : > { %2022 = vst [vmem:[%s3216_s7 + $0x30] sm:$0xff] %v2006_v58  ;;  %2023 = vst [vmem:[%s3216_s7 + $0x38] sm:$0xff] %v2007_v29 }
 0x3d7   : > { %v2213_v14 = vpop.eup %2212 }
 0x3d8   : > { %v2215_v22 = vpop.eup %2214  ;;  %v2008_v34 = vmul.f32 %v2228_v41, %v2213_v14  ;;  %v2009_v53 = vmul.f32 %v2229_v46, %v2213_v14 }
 0x3d9   : > { %v2010_v21 = vmul.f32 %v2230_v35, %v2215_v22  ;;  %v2011_v26 = vmul.f32 %v2231_v33, %v2215_v22 }
 0x3da   : > { %2024 = vst [vmem:[%s3216_s7 + $0x40] sm:$0xff] %v2008_v34  ;;  %2025 = vst [vmem:[%s3216_s7 + $0x48] sm:$0xff] %v2009_v53 }
 0x3db   : > { %v2217_v25 = vpop.eup %2216  ;;  %2026 = vst [vmem:[%s3216_s7 + $0x50] sm:$0xff] %v2010_v21  ;;  %2027 = vst [vmem:[%s3216_s7 + $0x58] sm:$0xff] %v2011_v26 }
 0x3dc   : > { %v2219_v54 = vpop.eup %2218  ;;  %v2012_v36 = vmul.f32 %v2232_v20, %v2217_v25  ;;  %v2013_v44 = vmul.f32 %v2233_v37, %v2217_v25 }
 0x3dd   : > { %v2014_v40 = vmul.f32 %v2234_v61, %v2219_v54  ;;  %v2015_v52 = vmul.f32 %v2235_v1, %v2219_v54 }
 0x3de   : > { %2028 = vst [vmem:[%s3216_s7 + $0x60] sm:$0xff] %v2012_v36  ;;  %2029 = vst [vmem:[%s3216_s7 + $0x68] sm:$0xff] %v2013_v44 }
 0x3df   : > { %2030 = vst [vmem:[%s3216_s7 + $0x70] sm:$0xff] %v2014_v40  ;;  %2031 = vst [vmem:[%s3216_s7 + $0x78] sm:$0xff] %v2015_v52 }
 0x3e0   : > { %2279 = shalt.err (!%p2276_p2)
}
 0x3e1   : > { %s2280_s11 = scalar_lea.hbm %s3247_s19, 2048  ;;  %s2284_s10 = scalar_lea.hbm %s3302_s3, 4096 }
 0x3e2   : > { %p2281_p4 = scmp.ne.s32.totalorder %s3247_s19, %s2280_s11  ;;  %p2285_p9 = scmp.lt.u32.totalorder %s3247_s19, %s3302_s3 }
 0x3e3   : > { %p2286_p1 = scmp.lt.u32.totalorder %s2284_s10, %s2280_s11  ;;  %p2288_p6 = scmp.lt.u32.totalorder %s2280_s11, %s3247_s19 }
 0x3e4   : > { %p2282_p5 = pnand %p2281_p4, %p3309_p11 }
 0x3e5   : > { %p2287_p3 = por %p2286_p1, %p2285_p9 }
 0x3e6   : > { %p2283_p7 = pneg %p2282_p5 }
 0x3e7   : > { %p2289_p12 = por %p2288_p6, %p2287_p3 }
 0x3e9   : > { %p2290_p13 = pnand %p2289_p12, %p2283_p7 }
 0x3eb   : > { %2293 = shalt.err (!%p2290_p13)
}
 0x3ec   : > { %s2339_s6 = smov 256   ;;  %s2340_s7 = smov 16  }
 0x3ed   : > { %2137 = dma.vmem_to_hbm [thread:$0]  (%p3309_p11), %s3249_s8, 2048, %s3247_s19, %s2033_s20, %s2339_s6, %s2339_s6, %s2340_s7  }
 0x3ee PF: > { %s2061_s9 = sand.u32 1, %s2320_s12   ;;  %p3310_p8 = scmp.ne.s32.totalorder %s3307_s25, 0 }
 0x3ef   : > { %p3311_p10 = scmp.ge.s32.totalorder %s2332_s15, 2  ;;  %s2062_s17 = scalar_lea.sflag [#allocation4], %s2061_s9 }
 0x3f1   : > { %p2144_p0 = pnand %p3311_p10, %p3310_p8 }
 0x3f3   : > { %2315 = dma.done.wait (!%p2144_p0), %s2062_s17, 2048  }
 0x3f4   : > { %2317 = vsyncadd (!%p2144_p0), %s2062_s17, 4294965248  ;;  %p16_p2 = scmp.ge.s32.totalorder %s2386_s18, 4   ;;  %s3312_s12 = smov %s2324_s13 }
 0x3f5   : > { %s3313_s13 = smov %s2328_s14  ;;  %s3314_s14 = smov %s2398_s21 }
 0x3f6   : > { %s3315_s15 = smov %s2386_s18  ;;  %18 = sbr.rel (!%p16_p2) target bundleno = 5 (0x5), region = 77 }
 0x3fd   :  { %2067 = vsyncpa [#allocation3], 1 }
 0x3fe   :  { %2069 = vsyncpa [#allocation3 + $0x1], 1 }
 0x3ff   :  { %2070 = vsyncpa [#allocation4], 1 }
 0x400   :  { %2072 = vsyncpa [#allocation4 + $0x1], 1 }

</bundles_post_ra>
